<compile_context>
chip_gen: v7x
topology: tpu7x:2x2x1
jax: 0.10.0
libtpu: 0.0.40
codegen_flags: <defaults>
</compile_context>

<pallas_src>
import jax
import jax.numpy as jnp
from jax.experimental import pallas as pl
from jax.experimental.pallas import tpu as pltpu

MINIBATCH = 256          # from InstanceLabelResizeLayer
OUT_PAD = 128            # lane-dense padded classifier width (real width = 1)
D_IN, D_H1, D_H2 = 2048, 512, 256


def _instance_da_kernel(x_ref, w1_ref, b1_ref, w2_ref, b2_ref, w3_ref, b3_ref,
                        out_ref):
    # grad_reverse (GRLayer): identity in forward.
    # Load f32 tile, cast to bf16 in-VMEM for the MXU (no extra HBM pass).
    x = x_ref[...].astype(jnp.bfloat16)                       # (TILE_N, 2048)

    # dc_ip1 + ReLU (dropout = identity at inference); f32 accumulation.
    h1 = jnp.dot(x, w1_ref[...], preferred_element_type=jnp.float32)
    h1 = jnp.maximum(h1 + b1_ref[...], 0.0)                   # f32

    # dc_ip2 + ReLU (dropout = identity at inference).
    h2 = jnp.dot(h1.astype(jnp.bfloat16), w2_ref[...],
                 preferred_element_type=jnp.float32)
    h2 = jnp.maximum(h2 + b2_ref[...], 0.0)                   # f32

    # classifier: lane-dense (256, 128) weight; only lane 0 is real,
    # lanes 1..127 are zero and sliced off in the wrapper.
    logits = jnp.dot(h2.astype(jnp.bfloat16), w3_ref[...],
                     preferred_element_type=jnp.float32)
    logits = logits + b3_ref[0]                               # SMEM scalar bias
    out_ref[...] = jax.nn.sigmoid(logits).astype(out_ref.dtype)


def prepare_params(params):
    """One-time device-side parameter preprocessing (hoisted out of forward)."""
    w1, b1, w2, b2, w3, b3 = params
    w1_bf = w1.astype(jnp.bfloat16)
    w2_bf = w2.astype(jnp.bfloat16)
    w3_pad = jnp.zeros((D_H2, OUT_PAD), jnp.bfloat16)
    w3_pad = w3_pad.at[:, :1].set(w3.astype(jnp.bfloat16))
    b1_f = b1.reshape(1, D_H1).astype(jnp.float32)
    b2_f = b2.reshape(1, D_H2).astype(jnp.float32)
    b3_s = b3.reshape((1,)).astype(jnp.float32)               # SMEM scalar
    # TODO(synk): generation-specific weight compression (int8 w1 on v5e/v6e,
    # fp8-e4m3 on v7x) not applied; bf16 kept for accuracy parity.
    return (w1_bf, b1_f, w2_bf, b2_f, w3_pad, b3_s)


def _choose_tile(n):
    if n <= 256:
        return max(16, ((n + 15) // 16) * 16)   # one full tile, no grid loop
    if n >= 1024:
        return 512                              # fewer grid steps, bigger DMAs
    return 256


def instance_da_forward(x, need_backprop, prepped):
    """Forward of _InstanceDA. Returns (scores (N,1) f32, resized labels (N,1))."""
    w1_bf, b1_f, w2_bf, b2_f, w3_pad, b3_s = prepped
    N, d_in = x.shape
    assert d_in == D_IN

    tile_n = _choose_tile(N)
    n_tiles = pl.cdiv(N, tile_n)
    n_pad = n_tiles * tile_n
    x_in = x.astype(jnp.float32)
    if n_pad != N:
        # TODO(synk): have the upstream RoI-feature producer emit a padded
        # (ideally bf16) feature tensor to remove this extra HBM pass.
        x_in = jnp.pad(x_in, ((0, n_pad - N), (0, 0)))

    # Megacore sharding only pays off once per-core x traffic dominates the
    # duplicated ~2.3 MiB resident weight set.
    dim_sem = ("parallel",) if n_tiles >= 4 else ("arbitrary",)
    vmem_limit = (24 << 20) if tile_n >= 512 else (16 << 20)

    weight_bytes = (2 * (D_IN * D_H1 + D_H1 * D_H2 + D_H2 * OUT_PAD)
                    + 4 * (D_H1 + D_H2 + 1))
    cost = pl.CostEstimate(
        flops=2 * n_pad * (D_IN * D_H1 + D_H1 * D_H2 + D_H2 * OUT_PAD),
        transcendentals=n_pad * OUT_PAD,
        bytes_accessed=4 * n_pad * D_IN + weight_bytes + 2 * n_pad * OUT_PAD,
    )

    resident = pl.Buffered(1)   # constant-index blocks: DMA once, no 2x buffer
    out = pl.pallas_call(
        _instance_da_kernel,
        out_shape=jax.ShapeDtypeStruct((n_pad, OUT_PAD), jnp.bfloat16),
        grid=(n_tiles,),
        in_specs=[
            pl.BlockSpec((tile_n, D_IN), lambda i: (i, 0)),              # x tile
            pl.BlockSpec((D_IN, D_H1), lambda i: (0, 0),
                         pipeline_mode=resident),                        # w1
            pl.BlockSpec((1, D_H1), lambda i: (0, 0),
                         pipeline_mode=resident),                        # b1
            pl.BlockSpec((D_H1, D_H2), lambda i: (0, 0),
                         pipeline_mode=resident),                        # w2
            pl.BlockSpec((1, D_H2), lambda i: (0, 0),
                         pipeline_mode=resident),                        # b2
            pl.BlockSpec((D_H2, OUT_PAD), lambda i: (0, 0),
                         pipeline_mode=resident),                        # w3 padded
            pl.BlockSpec(memory_space=pltpu.MemorySpace.SMEM),           # b3 scalar
        ],
        out_specs=pl.BlockSpec((tile_n, OUT_PAD), lambda i: (i, 0)),
        compiler_params=pltpu.CompilerParams(
            dimension_semantics=dim_sem,
            vmem_limit_bytes=vmem_limit,
        ),
        cost_estimate=cost,
    )(x_in, w1_bf, b1_f, w2_bf, b2_f, w3_pad, b3_s)

    scores = out[:N, :1].astype(jnp.float32)                  # real lane 0 only

    # InstanceLabelResizeLayer: rows i*256:(i+1)*256 get label lbs[i];
    # rows past B*256 keep the numpy ones() initialization (1.0).
    B = need_backprop.shape[0]
    row_group = jnp.arange(N) // MINIBATCH
    lbs = need_backprop.astype(jnp.float32)[jnp.clip(row_group, 0, B - 1)]
    label = jnp.where(row_group < B, lbs, 1.0)[:, None].astype(jnp.float32)
    return scores, label


def init_params(key):
    """Deterministic synthetic parameters matching _InstanceDA.__init__ shapes.
    Weights stored as (in, out) = transpose of PyTorch (out, in)."""
    k1, k2, k3, k4, k5, k6 = jax.random.split(key, 6)
    w1 = jax.random.normal(k1, (D_IN, D_H1), jnp.float32) * 0.02
    b1 = jax.random.normal(k2, (1, D_H1), jnp.float32) * 0.02
    w2 = jax.random.normal(k3, (D_H1, D_H2), jnp.float32) * 0.02
    b2 = jax.random.normal(k4, (1, D_H2), jnp.float32) * 0.02
    w3 = jax.random.normal(k5, (D_H2, 1), jnp.float32) * 0.02
    b3 = jax.random.normal(k6, (1, 1), jnp.float32) * 0.02
    return (w1, b1, w2, b2, w3, b3)


if __name__ == "__main__":
    key = jax.random.PRNGKey(0)
    kp, kx = jax.random.split(key)
    raw_params = init_params(kp)
    prepped = prepare_params(raw_params)          # one-time prep, not per call
    jax.block_until_ready(prepped)

    # Small instance batch: 16 RoI features of dim 2048, 2 images' flags.
    N = 16
    x = jax.random.normal(kx, (N, D_IN), jnp.float32)
    need_backprop = jnp.array([1.0, 0.0], dtype=jnp.float32)

    scores, labels = instance_da_forward(x, need_backprop, prepped)
    jax.block_until_ready((scores, labels))

    # Reference in plain JAX (f32).
    w1, b1, w2, b2, w3, b3 = raw_params
    h1 = jnp.maximum(x @ w1 + b1, 0.0)
    h2 = jnp.maximum(h1 @ w2 + b2, 0.0)
    ref = jax.nn.sigmoid(h2 @ w3 + b3)

    assert scores.shape == (N, 1) and labels.shape == (N, 1)
    # bf16 matmul inputs + bf16 output with f32 accumulation: relaxed tolerance.
    assert jnp.allclose(scores, ref, atol=2e-2, rtol=2e-2), "mismatch vs reference"
    # Label glue check: first 256 rows belong to image 0 -> label 1.0.
    assert jnp.allclose(labels, jnp.ones((N, 1), jnp.float32)), "label mismatch"

    print("KERNEL_OK")
</pallas_src>

<mosaic_0001>
module attributes {stable_mosaic.version = 11 : i64} {
  func.func @_instance_da_kernel(%arg0: i32, %arg1: memref<16x2048xf32, #tpu.memory_space<vmem>>, %arg2: memref<2048x512xbf16, #tpu.memory_space<vmem>>, %arg3: memref<1x512xf32, #tpu.memory_space<vmem>>, %arg4: memref<512x256xbf16, #tpu.memory_space<vmem>>, %arg5: memref<1x256xf32, #tpu.memory_space<vmem>>, %arg6: memref<256x128xbf16, #tpu.memory_space<vmem>>, %arg7: memref<1xf32, #tpu.memory_space<smem>>, %arg8: memref<16x128xbf16, #tpu.memory_space<vmem>>) attributes {dimension_semantics = [#tpu.dimension_semantics<arbitrary>], iteration_bounds = array<i64: 1>, scalar_prefetch = 0 : i64, scratch_operands = 0 : i64, tpu.core_type = #tpu.core_type<tc>, window_params = [{transform_indices = @transform_0, window_bounds = array<i64: 16, 2048>}, {pipeline_mode = #tpu.pipeline_mode<synchronous>, transform_indices = @transform_1, window_bounds = array<i64: 2048, 512>}, {pipeline_mode = #tpu.pipeline_mode<synchronous>, transform_indices = @transform_2, window_bounds = array<i64: 1, 512>}, {pipeline_mode = #tpu.pipeline_mode<synchronous>, transform_indices = @transform_3, window_bounds = array<i64: 512, 256>}, {pipeline_mode = #tpu.pipeline_mode<synchronous>, transform_indices = @transform_4, window_bounds = array<i64: 1, 256>}, {pipeline_mode = #tpu.pipeline_mode<synchronous>, transform_indices = @transform_5, window_bounds = array<i64: 256, 128>}, {transform_indices = @transform_6, window_bounds = array<i64: 1>}, {transform_indices = @transform_7, window_bounds = array<i64: 16, 128>}]} {
    %c0 = arith.constant 0 : index
    %c0_0 = arith.constant 0 : index
    %0 = vector.load %arg1[%c0, %c0_0] : memref<16x2048xf32, #tpu.memory_space<vmem>>, vector<16x2048xf32>
    %1 = arith.truncf %0 : vector<16x2048xf32> to vector<16x2048xbf16>
    %c0_1 = arith.constant 0 : index
    %c0_2 = arith.constant 0 : index
    %2 = vector.load %arg2[%c0_1, %c0_2] : memref<2048x512xbf16, #tpu.memory_space<vmem>>, vector<2048x512xbf16>
    %cst = arith.constant dense<0.000000e+00> : vector<16x512xf32>
    %3 = tpu.matmul %1, %2, %cst {dimension_numbers = #tpu.dot_dimension_numbers<[1], [0], [0], [1], [0, 0, 1, 1], [], []>} : vector<16x2048xbf16>, vector<2048x512xbf16>, vector<16x512xf32> -> vector<16x512xf32>
    %c0_3 = arith.constant 0 : index
    %c0_4 = arith.constant 0 : index
    %4 = vector.load %arg3[%c0_3, %c0_4] : memref<1x512xf32, #tpu.memory_space<vmem>>, vector<1x512xf32>
    %5 = vector.broadcast %4 : vector<1x512xf32> to vector<16x512xf32>
    %6 = arith.addf %3, %5 : vector<16x512xf32>
    %cst_5 = arith.constant 0.000000e+00 : f32
    %7 = vector.broadcast %cst_5 : f32 to vector<16x512xf32>
    %8 = arith.maximumf %6, %7 : vector<16x512xf32>
    %9 = arith.truncf %8 : vector<16x512xf32> to vector<16x512xbf16>
    %c0_6 = arith.constant 0 : index
    %c0_7 = arith.constant 0 : index
    %10 = vector.load %arg4[%c0_6, %c0_7] : memref<512x256xbf16, #tpu.memory_space<vmem>>, vector<512x256xbf16>
    %cst_8 = arith.constant dense<0.000000e+00> : vector<16x256xf32>
    %11 = tpu.matmul %9, %10, %cst_8 {dimension_numbers = #tpu.dot_dimension_numbers<[1], [0], [0], [1], [0, 0, 1, 1], [], []>} : vector<16x512xbf16>, vector<512x256xbf16>, vector<16x256xf32> -> vector<16x256xf32>
    %c0_9 = arith.constant 0 : index
    %c0_10 = arith.constant 0 : index
    %12 = vector.load %arg5[%c0_9, %c0_10] : memref<1x256xf32, #tpu.memory_space<vmem>>, vector<1x256xf32>
    %13 = vector.broadcast %12 : vector<1x256xf32> to vector<16x256xf32>
    %14 = arith.addf %11, %13 : vector<16x256xf32>
    %cst_11 = arith.constant 0.000000e+00 : f32
    %15 = vector.broadcast %cst_11 : f32 to vector<16x256xf32>
    %16 = arith.maximumf %14, %15 : vector<16x256xf32>
    %17 = arith.truncf %16 : vector<16x256xf32> to vector<16x256xbf16>
    %c0_12 = arith.constant 0 : index
    %c0_13 = arith.constant 0 : index
    %18 = vector.load %arg6[%c0_12, %c0_13] : memref<256x128xbf16, #tpu.memory_space<vmem>>, vector<256x128xbf16>
    %cst_14 = arith.constant dense<0.000000e+00> : vector<16x128xf32>
    %19 = tpu.matmul %17, %18, %cst_14 {dimension_numbers = #tpu.dot_dimension_numbers<[1], [0], [0], [1], [0, 0, 1, 1], [], []>} : vector<16x256xbf16>, vector<256x128xbf16>, vector<16x128xf32> -> vector<16x128xf32>
    %c0_15 = arith.constant 0 : index
    %20 = memref.load %arg7[%c0_15] : memref<1xf32, #tpu.memory_space<smem>>
    %21 = vector.broadcast %20 : f32 to vector<16x128xf32>
    %22 = arith.addf %19, %21 : vector<16x128xf32>
    %23 = arith.negf %22 : vector<16x128xf32>
    %24 = math.exp %23 : vector<16x128xf32>
    %cst_16 = arith.constant 1.000000e+00 : f32
    %25 = vector.broadcast %cst_16 : f32 to vector<16x128xf32>
    %26 = arith.addf %25, %24 : vector<16x128xf32>
    %27 = arith.divf %25, %26 : vector<16x128xf32>
    %28 = arith.truncf %27 : vector<16x128xf32> to vector<16x128xbf16>
    %c0_17 = arith.constant 0 : index
    %c0_18 = arith.constant 0 : index
    %29 = vector.load %arg8[%c0_17, %c0_18] : memref<16x128xbf16, #tpu.memory_space<vmem>>, vector<16x128xbf16>
    tpu.vector_store %arg8[%c0_17, %c0_18], %28 {strides = array<i32>} : memref<16x128xbf16, #tpu.memory_space<vmem>>, vector<16x128xbf16>,
    return
  }
  func.func @transform_0(%arg0: i32) -> (i32, i32) {
    %c0_i32 = arith.constant 0 : i32
    %c0_i32_0 = arith.constant 0 : i32
    return %arg0, %c0_i32 : i32, i32
  }
  func.func @transform_1(%arg0: i32) -> (i32, i32) {
    %c0_i32 = arith.constant 0 : i32
    %c0_i32_0 = arith.constant 0 : i32
    %c0_i32_1 = arith.constant 0 : i32
    return %c0_i32, %c0_i32_0 : i32, i32
  }
  func.func @transform_2(%arg0: i32) -> (i32, i32) {
    %c0_i32 = arith.constant 0 : i32
    %c0_i32_0 = arith.constant 0 : i32
    %c0_i32_1 = arith.constant 0 : i32
    return %c0_i32, %c0_i32_0 : i32, i32
  }
  func.func @transform_3(%arg0: i32) -> (i32, i32) {
    %c0_i32 = arith.constant 0 : i32
    %c0_i32_0 = arith.constant 0 : i32
    %c0_i32_1 = arith.constant 0 : i32
    return %c0_i32, %c0_i32_0 : i32, i32
  }
  func.func @transform_4(%arg0: i32) -> (i32, i32) {
    %c0_i32 = arith.constant 0 : i32
    %c0_i32_0 = arith.constant 0 : i32
    %c0_i32_1 = arith.constant 0 : i32
    return %c0_i32, %c0_i32_0 : i32, i32
  }
  func.func @transform_5(%arg0: i32) -> (i32, i32) {
    %c0_i32 = arith.constant 0 : i32
    %c0_i32_0 = arith.constant 0 : i32
    %c0_i32_1 = arith.constant 0 : i32
    return %c0_i32, %c0_i32_0 : i32, i32
  }
  func.func @transform_6(%arg0: i32) -> i32 {
    %c0_i32 = arith.constant 0 : i32
    %c0_i32_0 = arith.constant 0 : i32
    return %c0_i32 : i32
  }
  func.func @transform_7(%arg0: i32) -> (i32, i32) {
    %c0_i32 = arith.constant 0 : i32
    %c0_i32_0 = arith.constant 0 : i32
    return %arg0, %c0_i32 : i32, i32
  }
}

</mosaic_0001>

<bundles_post_ra>
// kernel: tpu_custom_call.1
= control target key start
LH: loop header
LB: loop body
LE: loop exit
PB: predicated region body
PF: predicated region fallthrough
CT: control target
= control target key end

     0   :  { %13 = vsyncpa [#allocation4], 0  ;;  %s6656_s0 = inlined_call_operand.hbm [shape: f32[16,2048], index: 0, kind: input, shape index: {}]   ;;  %s6657_s1 = inlined_call_operand.hbm [shape: bf16[2048,512], index: 1, kind: input, shape index: {}]   ;;  %s6658_s2 = inlined_call_operand.hbm [shape: f32[1,512], index: 2, kind: input, shape index: {}]   ;;  %s6659_s3 = inlined_call_operand.hbm [shape: bf16[512,256], index: 3, kind: input, shape index: {}]   ;;  %s6660_s4 = inlined_call_operand.hbm [shape: f32[1,256], index: 4, kind: input, shape index: {}]   ;;  %s6661_s5 = inlined_call_operand.hbm [shape: bf16[256,128], index: 5, kind: input, shape index: {}]   ;;  %s6662_s6 = inlined_call_operand.<no memory space> [shape: f32[1], index: 6, kind: input, shape index: {}]   ;;  %s6663_s7 = inlined_call_operand.hbm [shape: bf16[16,128], index: 7, kind: output, shape index: {}]  }
   0x1   :  { %14 = vsyncpa [#allocation7], 0 }
   0x2   :  { %15 = vsyncpa [#allocation10], 0 }
   0x3   :  { %16 = vsyncpa [#allocation13], 0 }
   0x4   :  { %17 = vsyncpa [#allocation5], 0  ;;  %s6413_s24 = smov [#allocation6]   ;;  %s6249_s28 = scalar_lea.hbm %s6657_s1, 65536 }
   0x5   :  { %s35_s25 = sshll.u32 %s6413_s24, 4  ;;  %p6250_p0 = scmp.ne.s32.totalorder %s6657_s1, %s6249_s28  ;;  %s36_s25 = int_to_ptr.vmem [resolvable:$true] %s35_s25 }
   0x6   :  { %p6253_p1 = scmp.lt.u32.totalorder %s6249_s28, %s6657_s1 }
   0x8   :  { %p6255_p2 = pnand %p6253_p1, %p6250_p0 }
   0xa   :  { %6258 = shalt.err (!%p6255_p2)
}
   0xb   :  { %s6259_s10 = scalar_lea.vmem %s36_s25, 65536  ;;  %p6264_p4 = scmp.lt.s32.totalorder %s36_s25, %s36_s25 }
   0xc   :  { %p6260_p3 = scmp.ne.s32.totalorder %s36_s25, %s6259_s10  ;;  %p6265_p5 = scmp.lt.s32.totalorder %s6259_s10, %s6259_s10 }
   0xe   :  { %p6266_p6 = por %p6265_p5, %p6264_p4 }
  0x10   :  { %p6267_p7 = pnand %p6266_p6, %p6260_p3 }
  0x12   :  { %6270 = shalt.err (!%p6267_p7)
}
  0x13   :  { %s6414_s11 = smov 256   ;;  %s6415_s12 = smov 16  }
  0x14   :  { %41 = dma.hbm_to_vmem [thread:$0]  %s6657_s1, 65536, %s36_s25, [#allocation7], %s6414_s11, %s6414_s11, %s6415_s12  }
  0x15   :  { %s6416_s15 = smov [#allocation9]   ;;  %s6417_s17 = smov [#allocation3]  }
  0x16   :  { %s57_s16 = sshll.u32 %s6416_s15, 4  ;;  %s23_s18 = sshll.u32 %s6417_s17, 4  ;;  %s58_s16 = int_to_ptr.vmem [resolvable:$true] %s57_s16  ;;  %s24_s18 = int_to_ptr.vmem [resolvable:$true] %s23_s18 }
  0x17   :  { %s6271_s21 = scalar_lea.hbm %s6659_s3, 8192 }
  0x18   :  { %p6272_p8 = scmp.ne.s32.totalorder %s6659_s3, %s6271_s21  ;;  %p6275_p9 = scmp.lt.u32.totalorder %s6271_s21, %s6659_s3 }
  0x1a   :  { %p6277_p10 = pnand %p6275_p9, %p6272_p8 }
  0x1c   :  { %6280 = shalt.err (!%p6277_p10)
}
  0x1d   :  { %s6281_s1 = scalar_lea.vmem %s58_s16, 8192  ;;  %p6286_p12 = scmp.lt.s32.totalorder %s58_s16, %s58_s16 }
  0x1e   :  { %p6282_p11 = scmp.ne.s32.totalorder %s58_s16, %s6281_s1  ;;  %p6287_p13 = scmp.lt.s32.totalorder %s6281_s1, %s6281_s1 }
  0x20   :  { %p6288_p0 = por %p6287_p13, %p6286_p12 }
  0x22   :  { %p6289_p1 = pnand %p6288_p0, %p6282_p11 }
  0x24   :  { %6292 = shalt.err (!%p6289_p1)
}
  0x25   :  { %s6418_s25 = smov 128   ;;  %s6419_s27 = smov 8  }
  0x26   :  { %63 = dma.hbm_to_vmem [thread:$0]  %s6659_s3, 8192, %s58_s16, [#allocation10], %s6418_s25, %s6418_s25, %s6419_s27  }
  0x27   :  { %s6293_s9 = scalar_lea.hbm %s6656_s0, 4096 }
  0x28   :  { %p6294_p2 = scmp.ne.s32.totalorder %s6656_s0, %s6293_s9  ;;  %p6297_p3 = scmp.lt.u32.totalorder %s6293_s9, %s6656_s0 }
  0x2a   :  { %p6299_p4 = pnand %p6297_p3, %p6294_p2 }
  0x2c   :  { %6302 = shalt.err (!%p6299_p4)
}
  0x2d   :  { %s6303_s14 = scalar_lea.vmem %s24_s18, 4096  ;;  %p6308_p6 = scmp.lt.s32.totalorder %s24_s18, %s24_s18 }
  0x2e   :  { %p6304_p5 = scmp.ne.s32.totalorder %s24_s18, %s6303_s14  ;;  %p6309_p7 = scmp.lt.s32.totalorder %s6303_s14, %s6303_s14 }
  0x30   :  { %p6310_p8 = por %p6309_p7, %p6308_p6 }
  0x32   :  { %p6311_p9 = pnand %p6310_p8, %p6304_p5 }
  0x34   :  { %6314 = shalt.err (!%p6311_p9)
}
  0x35   :  { %s6420_s3 = smov 2048   ;;  %s6421_s17 = smov [#allocation8]  }
  0x36   :  { %29 = dma.hbm_to_vmem [thread:$0]  %s6656_s0, 4096, %s24_s18, [#allocation4], %s6420_s3, %s6420_s3, %s6418_s25  }
  0x37   :  { %s48_s19 = sshll.u32 %s6421_s17, 4  ;;  %s6422_s20 = smov [#allocation11]   ;;  %s49_s19 = int_to_ptr.vmem [resolvable:$true] %s48_s19 }
  0x38   :  { %s70_s21 = sshll.u32 %s6422_s20, 4  ;;  %s6315_s24 = scalar_lea.hbm %s6658_s2, 64  ;;  %s71_s21 = int_to_ptr.vmem [resolvable:$true] %s70_s21 }
  0x39   :  { %p6316_p10 = scmp.ne.s32.totalorder %s6658_s2, %s6315_s24  ;;  %p6319_p11 = scmp.lt.u32.totalorder %s6315_s24, %s6658_s2 }
  0x3b   :  { %p6321_p12 = pnand %p6319_p11, %p6316_p10 }
  0x3d   :  { %6324 = shalt.err (!%p6321_p12)
}
  0x3e   :  { %s6325_s0 = scalar_lea.vmem %s49_s19, 64  ;;  %p6330_p0 = scmp.lt.s32.totalorder %s49_s19, %s49_s19 }
  0x3f   :  { %p6326_p13 = scmp.ne.s32.totalorder %s49_s19, %s6325_s0  ;;  %p6331_p1 = scmp.lt.s32.totalorder %s6325_s0, %s6325_s0 }
  0x41   :  { %p6332_p2 = por %p6331_p1, %p6330_p0 }
  0x43   :  { %p6333_p3 = pnand %p6332_p2, %p6326_p13 }
  0x45   :  { %6336 = shalt.err (!%p6333_p3)
}
  0x46   :  { %51 = dma.hbm_to_vmem [thread:$0]  %s6658_s2, 64, %s49_s19, [#allocation7]  }
  0x47   :  { %s6337_s8 = scalar_lea.hbm %s6660_s4, 32 }
  0x48   :  { %p6338_p4 = scmp.ne.s32.totalorder %s6660_s4, %s6337_s8  ;;  %p6341_p5 = scmp.lt.u32.totalorder %s6337_s8, %s6660_s4 }
  0x4a   :  { %p6343_p6 = pnand %p6341_p5, %p6338_p4 }
  0x4c   :  { %6346 = shalt.err (!%p6343_p6)
}
  0x4d   :  { %s6347_s13 = scalar_lea.vmem %s71_s21, 32  ;;  %p6352_p8 = scmp.lt.s32.totalorder %s71_s21, %s71_s21 }
  0x4e   :  { %p6348_p7 = scmp.ne.s32.totalorder %s71_s21, %s6347_s13  ;;  %p6353_p9 = scmp.lt.s32.totalorder %s6347_s13, %s6347_s13 }
  0x50   :  { %p6354_p10 = por %p6353_p9, %p6352_p8 }
  0x52   :  { %p6355_p11 = pnand %p6354_p10, %p6348_p7 }
  0x54   :  { %6358 = shalt.err (!%p6355_p11)
}
  0x55   :  { %73 = dma.hbm_to_vmem [thread:$0]  %s6660_s4, 32, %s71_s21, [#allocation10]  }
  0x56   :  { %s6423_s3 = smov [#allocation12]   ;;  %s6359_s19 = scalar_lea.hbm %s6661_s5, 2048 }
  0x57   :  { %s79_s15 = sshll.u32 %s6423_s3, 4  ;;  %p6360_p12 = scmp.ne.s32.totalorder %s6661_s5, %s6359_s19  ;;  %s80_s15 = int_to_ptr.vmem [resolvable:$true] %s79_s15 }
  0x58   :  { %p6363_p13 = scmp.lt.u32.totalorder %s6359_s19, %s6661_s5 }
  0x5a   :  { %p6365_p0 = pnand %p6363_p13, %p6360_p12 }
  0x5c   :  { %6368 = shalt.err (!%p6365_p0)
}
  0x5d   :  { %s6369_s26 = scalar_lea.vmem %s80_s15, 2048  ;;  %p6374_p2 = scmp.lt.s32.totalorder %s80_s15, %s80_s15 }
  0x5e   :  { %p6370_p1 = scmp.ne.s32.totalorder %s80_s15, %s6369_s26  ;;  %p6375_p3 = scmp.lt.s32.totalorder %s6369_s26, %s6369_s26 }
  0x60   :  { %p6376_p4 = por %p6375_p3, %p6374_p2 }
  0x62   :  { %p6377_p5 = pnand %p6376_p4, %p6370_p1 }
  0x64   :  { %6380 = shalt.err (!%p6377_p5)
}
  0x65   :  { %s6424_s4 = smov 64   ;;  %s6425_s21 = smov 4  }
  0x66   :  { %85 = dma.hbm_to_vmem [thread:$0]  %s6661_s5, 2048, %s80_s15, [#allocation13], %s6424_s4, %s6424_s4, %s6425_s21  }
  0x67   :  { %6403 = dma.done.wait [#allocation4], 4096  }
  0x68   :  { %6404 = vsyncadd [#allocation4], 4294963200 }
  0x69   :  { %6405 = dma.done.wait [#allocation7], 65600  }
  0x6a   :  { %6406 = vsyncadd [#allocation7], 4294901696 }
  0x6b   :  { %6407 = dma.done.wait [#allocation10], 8224  }
  0x6c   :  { %6408 = vsyncadd [#allocation10], 4294959072 }
  0x6d   :  { %6409 = dma.done.wait [#allocation13], 2048  }
  0x6e   :  { %6410 = vsyncadd [#allocation13], 4294965248  ;;  %v5361_v0 = vld [vmem:[#allocation6 + $0x4] ss:$16 sps:$4 sm:$0xff]   ;;  %v5365_v2 = vld [vmem:[#allocation6] ss:$16 sps:$4 sm:$0xff]  }
  0x6f   :  { %v5363_v1 = vld [vmem:[#allocation6 + $0x204] ss:$16 sps:$4 sm:$0xff]   ;;  %3249 = vmatprep.subr.bf16.mxu1 %v5361_v0  ;;  %v5366_v3 = vld [vmem:[#allocation6 + $0x200] ss:$16 sps:$4 sm:$0xff]   ;;  %v108_v46 = vld [vmem:[#allocation3 + $0x8] sm:$0xff]  ;;  %s6426_s0 = smov [#allocation14]  }
  0x70   :  { %3292 = vmatprep.subr.bf16.mxu0 %v5363_v1  ;;  %v5367_v4 = vld [vmem:[#allocation6 + $0x24] ss:$16 sps:$4 sm:$0xff]   ;;  %3250 = vmatpush1.bf16.msra.mxu1 %v5365_v2  ;;  %v5371_v6 = vld [vmem:[#allocation6 + $0x20] ss:$16 sps:$4 sm:$0xff]   ;;  %v124_v49 = vld [vmem:[#allocation3 + $0x88] sm:$0xff]  ;;  %s4635_s18 = sshll.u32 %s6426_s0, 4  ;;  %s4636_s18 = int_to_ptr.vmem [resolvable:$true] %s4635_s18 }
  0x71   :  { %3293 = vmatpush1.bf16.msra.mxu0 %v5366_v3  ;;  %v5369_v5 = vld [vmem:[#allocation6 + $0x224] ss:$16 sps:$4 sm:$0xff]   ;;  %3251 = vmatprep.subr.bf16.mxu1 %v5367_v4  ;;  %v5372_v7 = vld [vmem:[#allocation6 + $0x220] ss:$16 sps:$4 sm:$0xff]   ;;  %v6542_v50 = vpack.c.bf16 %v124_v49, %v108_v46  ;;  %v110_v51 = vld [vmem:[#allocation3 + $0x18] sm:$0xff]  ;;  %p6386_p7 = scmp.lt.s32.totalorder %s4636_s18, %s4636_s18 }
  0x72   :  { %3294 = vmatprep.subr.bf16.mxu0 %v5369_v5  ;;  %v5373_v8 = vld [vmem:[#allocation6 + $0x44] ss:$16 sps:$4 sm:$0xff]   ;;  %v5377_v10 = vld [vmem:[#allocation6 + $0x40] ss:$16 sps:$4 sm:$0xff]   ;;  %v126_v52 = vld [vmem:[#allocation3 + $0x98] sm:$0xff] }
  0x73   :  { %v5375_v9 = vld [vmem:[#allocation6 + $0x244] ss:$16 sps:$4 sm:$0xff]   ;;  %v5378_v11 = vld [vmem:[#allocation6 + $0x240] ss:$16 sps:$4 sm:$0xff]   ;;  %v6544_v55 = vpack.c.bf16 %v126_v52, %v110_v51  ;;  %3281 = vmatprep.mubr.bf16.mxu1 %v6542_v50  ;;  %v5502_v46 = vld [vmem:[#allocation6 + $0xe8] ss:$16 sps:$4 sm:$0xff]  }
  0x74   :  { %3252 = vmatpush1.bf16.msra.mxu1 %v5371_v6  ;;  %v5379_v12 = vld [vmem:[#allocation6 + $0x64] ss:$16 sps:$4 sm:$0xff]   ;;  %v5383_v14 = vld [vmem:[#allocation6 + $0x60] ss:$16 sps:$4 sm:$0xff]   ;;  %v5516_v52 = vld [vmem:[#allocation6 + $0x12c] ss:$16 sps:$4 sm:$0xff]  }
  0x75   :  { %3295 = vmatpush1.bf16.msra.mxu0 %v5372_v7  ;;  %3253 = vmatprep.subr.bf16.mxu1 %v5373_v8  ;;  %v5381_v13 = vld [vmem:[#allocation6 + $0x264] ss:$16 sps:$4 sm:$0xff]   ;;  %v5384_v15 = vld [vmem:[#allocation6 + $0x260] ss:$16 sps:$4 sm:$0xff]  }
  0x76   :  { %3296 = vmatprep.subr.bf16.mxu0 %v5375_v9  ;;  %v5385_v16 = vld [vmem:[#allocation6 + $0x84] ss:$16 sps:$4 sm:$0xff]   ;;  %v5389_v18 = vld [vmem:[#allocation6 + $0x80] ss:$16 sps:$4 sm:$0xff]   ;;  %3324 = vmatprep.mubr.bf16.mxu0 %v6544_v55 }
  0x77   :  { %v5387_v17 = vld [vmem:[#allocation6 + $0x284] ss:$16 sps:$4 sm:$0xff]   ;;  %v5390_v19 = vld [vmem:[#allocation6 + $0x280] ss:$16 sps:$4 sm:$0xff]  }
  0x78   :  { %3254 = vmatpush1.bf16.msra.mxu1 %v5377_v10  ;;  %v5391_v20 = vld [vmem:[#allocation6 + $0xa4] ss:$16 sps:$4 sm:$0xff]   ;;  %v5395_v22 = vld [vmem:[#allocation6 + $0xa0] ss:$16 sps:$4 sm:$0xff]  }
  0x79   :  { %3297 = vmatpush1.bf16.msra.mxu0 %v5378_v11  ;;  %3255 = vmatprep.subr.bf16.mxu1 %v5379_v12  ;;  %v5393_v21 = vld [vmem:[#allocation6 + $0x2a4] ss:$16 sps:$4 sm:$0xff]   ;;  %v5396_v23 = vld [vmem:[#allocation6 + $0x2a0] ss:$16 sps:$4 sm:$0xff]   ;;  %v5462_v11 = vld [vmem:[#allocation6 + $0xc] ss:$16 sps:$4 sm:$0xff]  }
  0x7a   :  { %3298 = vmatprep.subr.bf16.mxu0 %v5381_v13  ;;  %v5397_v24 = vld [vmem:[#allocation6 + $0xc4] ss:$16 sps:$4 sm:$0xff]   ;;  %v5401_v26 = vld [vmem:[#allocation6 + $0xc0] ss:$16 sps:$4 sm:$0xff]  }
  0x7b   :  { %v5399_v25 = vld [vmem:[#allocation6 + $0x2c4] ss:$16 sps:$4 sm:$0xff]   ;;  %v5402_v27 = vld [vmem:[#allocation6 + $0x2c0] ss:$16 sps:$4 sm:$0xff]  }
  0x7c   :  { %3256 = vmatpush1.bf16.msra.mxu1 %v5383_v14  ;;  %v5403_v28 = vld [vmem:[#allocation6 + $0xe4] ss:$16 sps:$4 sm:$0xff]   ;;  %v5407_v30 = vld [vmem:[#allocation6 + $0xe0] ss:$16 sps:$4 sm:$0xff]   ;;  %v5460_v14 = vld [vmem:[#allocation6 + $0x8] ss:$16 sps:$4 sm:$0xff]  }
  0x7d   :  { %3299 = vmatpush1.bf16.msra.mxu0 %v5384_v15  ;;  %3257 = vmatprep.subr.bf16.mxu1 %v5385_v16  ;;  %v5405_v29 = vld [vmem:[#allocation6 + $0x2e4] ss:$16 sps:$4 sm:$0xff]   ;;  %v5408_v31 = vld [vmem:[#allocation6 + $0x2e0] ss:$16 sps:$4 sm:$0xff]  }
  0x7e   :  { %3300 = vmatprep.subr.bf16.mxu0 %v5387_v17  ;;  %v5409_v32 = vld [vmem:[#allocation6 + $0x104] ss:$16 sps:$4 sm:$0xff]   ;;  %v5413_v34 = vld [vmem:[#allocation6 + $0x100] ss:$16 sps:$4 sm:$0xff]   ;;  %v5468_v17 = vld [vmem:[#allocation6 + $0x2c] ss:$16 sps:$4 sm:$0xff]  }
  0x7f   :  { %v5411_v33 = vld [vmem:[#allocation6 + $0x304] ss:$16 sps:$4 sm:$0xff]   ;;  %v5414_v35 = vld [vmem:[#allocation6 + $0x300] ss:$16 sps:$4 sm:$0xff]  }
  0x80   :  { %3258 = vmatpush1.bf16.msra.mxu1 %v5389_v18  ;;  %v5415_v36 = vld [vmem:[#allocation6 + $0x124] ss:$16 sps:$4 sm:$0xff]   ;;  %v5419_v38 = vld [vmem:[#allocation6 + $0x120] ss:$16 sps:$4 sm:$0xff]  }
  0x81   :  { %3301 = vmatpush1.bf16.msra.mxu0 %v5390_v19  ;;  %3259 = vmatprep.subr.bf16.mxu1 %v5391_v20  ;;  %v5417_v37 = vld [vmem:[#allocation6 + $0x324] ss:$16 sps:$4 sm:$0xff]   ;;  %v5420_v39 = vld [vmem:[#allocation6 + $0x320] ss:$16 sps:$4 sm:$0xff]   ;;  %v5466_v19 = vld [vmem:[#allocation6 + $0x28] ss:$16 sps:$4 sm:$0xff]  }
  0x82   :  { %3302 = vmatprep.subr.bf16.mxu0 %v5393_v21  ;;  %v5421_v40 = vld [vmem:[#allocation6 + $0x144] ss:$16 sps:$4 sm:$0xff]   ;;  %v5425_v42 = vld [vmem:[#allocation6 + $0x140] ss:$16 sps:$4 sm:$0xff]   ;;  %v5474_v21 = vld [vmem:[#allocation6 + $0x4c] ss:$16 sps:$4 sm:$0xff]  }
  0x83   :  { %v5423_v41 = vld [vmem:[#allocation6 + $0x344] ss:$16 sps:$4 sm:$0xff]   ;;  %v5426_v43 = vld [vmem:[#allocation6 + $0x340] ss:$16 sps:$4 sm:$0xff]  }
  0x84   :  { %3260 = vmatpush1.bf16.msra.mxu1 %v5395_v22  ;;  %v5427_v44 = vld [vmem:[#allocation6 + $0x164] ss:$16 sps:$4 sm:$0xff]   ;;  %v5431_v47 = vld [vmem:[#allocation6 + $0x160] ss:$16 sps:$4 sm:$0xff]  }
  0x85   :  { %3303 = vmatpush1.bf16.msra.mxu0 %v5396_v23  ;;  %3261 = vmatprep.subr.bf16.mxu1 %v5397_v24  ;;  %v5429_v45 = vld [vmem:[#allocation6 + $0x364] ss:$16 sps:$4 sm:$0xff]   ;;  %v5432_v48 = vld [vmem:[#allocation6 + $0x360] ss:$16 sps:$4 sm:$0xff]   ;;  %v5472_v23 = vld [vmem:[#allocation6 + $0x48] ss:$16 sps:$4 sm:$0xff]  }
  0x86   :  { %3304 = vmatprep.subr.bf16.mxu0 %v5399_v25  ;;  %v5433_v53 = vld [vmem:[#allocation6 + $0x184] ss:$16 sps:$4 sm:$0xff]   ;;  %v5437_v56 = vld [vmem:[#allocation6 + $0x180] ss:$16 sps:$4 sm:$0xff]   ;;  %v5480_v25 = vld [vmem:[#allocation6 + $0x6c] ss:$16 sps:$4 sm:$0xff]  }
  0x87   :  { %v5435_v54 = vld [vmem:[#allocation6 + $0x384] ss:$16 sps:$4 sm:$0xff]   ;;  %v5438_v57 = vld [vmem:[#allocation6 + $0x380] ss:$16 sps:$4 sm:$0xff]  }
  0x88   :  { %3262 = vmatpush1.bf16.msra.mxu1 %v5401_v26  ;;  %v5439_v58 = vld [vmem:[#allocation6 + $0x1a4] ss:$16 sps:$4 sm:$0xff]   ;;  %v5443_v60 = vld [vmem:[#allocation6 + $0x1a0] ss:$16 sps:$4 sm:$0xff]  }
  0x89   :  { %3305 = vmatpush1.bf16.msra.mxu0 %v5402_v27  ;;  %3263 = vmatprep.subr.bf16.mxu1 %v5403_v28  ;;  %v5441_v59 = vld [vmem:[#allocation6 + $0x3a4] ss:$16 sps:$4 sm:$0xff]   ;;  %v5444_v61 = vld [vmem:[#allocation6 + $0x3a0] ss:$16 sps:$4 sm:$0xff]   ;;  %v5478_v27 = vld [vmem:[#allocation6 + $0x68] ss:$16 sps:$4 sm:$0xff]  }
  0x8a   :  { %3306 = vmatprep.subr.bf16.mxu0 %v5405_v29  ;;  %v5445_v62 = vld [vmem:[#allocation6 + $0x1c4] ss:$16 sps:$4 sm:$0xff]   ;;  %v5449_v0 = vld [vmem:[#allocation6 + $0x1c0] ss:$16 sps:$4 sm:$0xff]   ;;  %v5486_v29 = vld [vmem:[#allocation6 + $0x8c] ss:$16 sps:$4 sm:$0xff]  }
  0x8b   :  { %v5447_v63 = vld [vmem:[#allocation6 + $0x3c4] ss:$16 sps:$4 sm:$0xff]   ;;  %v5450_v1 = vld [vmem:[#allocation6 + $0x3c0] ss:$16 sps:$4 sm:$0xff]  }
  0x8c   :  { %3264 = vmatpush1.bf16.msra.mxu1 %v5407_v30  ;;  %v5451_v2 = vld [vmem:[#allocation6 + $0x1e4] ss:$16 sps:$4 sm:$0xff]   ;;  %v5455_v4 = vld [vmem:[#allocation6 + $0x1e0] ss:$16 sps:$4 sm:$0xff]  }
  0x8d   :  { %3307 = vmatpush1.bf16.msra.mxu0 %v5408_v31  ;;  %3265 = vmatprep.subr.bf16.mxu1 %v5409_v32  ;;  %v5453_v3 = vld [vmem:[#allocation6 + $0x3e4] ss:$16 sps:$4 sm:$0xff]   ;;  %v5456_v5 = vld [vmem:[#allocation6 + $0x3e0] ss:$16 sps:$4 sm:$0xff]   ;;  %v5484_v31 = vld [vmem:[#allocation6 + $0x88] ss:$16 sps:$4 sm:$0xff]  }
  0x8e   :  { %3308 = vmatprep.subr.bf16.mxu0 %v5411_v33  ;;  %v107_v6 = vld [vmem:[#allocation3] sm:$0xff]  ;;  %v109_v9 = vld [vmem:[#allocation3 + $0x10] sm:$0xff]  ;;  %v5492_v33 = vld [vmem:[#allocation6 + $0xac] ss:$16 sps:$4 sm:$0xff]  }
  0x8f   :  { %v123_v7 = vld [vmem:[#allocation3 + $0x80] sm:$0xff]  ;;  %v125_v10 = vld [vmem:[#allocation3 + $0x90] sm:$0xff] }
  0x90   :  { %3266 = vmatpush1.bf16.msra.mxu1 %v5413_v34  ;;  %v5459_v8 = vld [vmem:[#allocation6 + $0x404] ss:$16 sps:$4 sm:$0xff]   ;;  %v6548_v12 = vpack.c.bf16 %v123_v7, %v107_v6  ;;  %v5457_v13 = vld [vmem:[#allocation6 + $0x400] ss:$16 sps:$4 sm:$0xff]   ;;  %v6550_v15 = vpack.c.bf16 %v125_v10, %v109_v9  ;;  %v5538_v7 = vld [vmem:[#allocation6 + $0x1a8] ss:$16 sps:$4 sm:$0xff]  }
  0x91   :  { %3309 = vmatpush1.bf16.msra.mxu0 %v5414_v35  ;;  %3267 = vmatprep.subr.bf16.mxu1 %v5415_v36  ;;  %v5465_v16 = vld [vmem:[#allocation6 + $0x424] ss:$16 sps:$4 sm:$0xff]   ;;  %v5463_v18 = vld [vmem:[#allocation6 + $0x420] ss:$16 sps:$4 sm:$0xff]   ;;  %v5490_v35 = vld [vmem:[#allocation6 + $0xa8] ss:$16 sps:$4 sm:$0xff]  }
  0x92   :  { %3310 = vmatprep.subr.bf16.mxu0 %v5417_v37  ;;  %v5471_v20 = vld [vmem:[#allocation6 + $0x444] ss:$16 sps:$4 sm:$0xff]   ;;  %v5469_v22 = vld [vmem:[#allocation6 + $0x440] ss:$16 sps:$4 sm:$0xff]   ;;  %v5498_v37 = vld [vmem:[#allocation6 + $0xcc] ss:$16 sps:$4 sm:$0xff]  }
  0x93   :  { %v5477_v24 = vld [vmem:[#allocation6 + $0x464] ss:$16 sps:$4 sm:$0xff]   ;;  %v5475_v26 = vld [vmem:[#allocation6 + $0x460] ss:$16 sps:$4 sm:$0xff]   ;;  %v5546_v9 = vld [vmem:[#allocation6 + $0x1cc] ss:$16 sps:$4 sm:$0xff]  }
  0x94   :  { %3268 = vmatpush1.bf16.msra.mxu1 %v5419_v38  ;;  %v5483_v28 = vld [vmem:[#allocation6 + $0x484] ss:$16 sps:$4 sm:$0xff]   ;;  %v5481_v30 = vld [vmem:[#allocation6 + $0x480] ss:$16 sps:$4 sm:$0xff]  }
  0x95   :  { %3311 = vmatpush1.bf16.msra.mxu0 %v5420_v39  ;;  %3269 = vmatprep.subr.bf16.mxu1 %v5421_v40  ;;  %v5489_v32 = vld [vmem:[#allocation6 + $0x4a4] ss:$16 sps:$4 sm:$0xff]   ;;  %v5487_v34 = vld [vmem:[#allocation6 + $0x4a0] ss:$16 sps:$4 sm:$0xff]   ;;  %v5496_v39 = vld [vmem:[#allocation6 + $0xc8] ss:$16 sps:$4 sm:$0xff]  }
  0x96   :  { %3312 = vmatprep.subr.bf16.mxu0 %v5423_v41  ;;  %v5495_v36 = vld [vmem:[#allocation6 + $0x4c4] ss:$16 sps:$4 sm:$0xff]   ;;  %v5493_v38 = vld [vmem:[#allocation6 + $0x4c0] ss:$16 sps:$4 sm:$0xff]   ;;  %v112_v40 = vld [vmem:[#allocation3 + $0x28] sm:$0xff] }
  0x97   :  { %v128_v41 = vld [vmem:[#allocation3 + $0xa8] sm:$0xff]  ;;  %v5505_v49 = vld [vmem:[#allocation6 + $0x500] ss:$16 sps:$4 sm:$0xff]   ;;  %v5513_v51 = vld [vmem:[#allocation6 + $0x524] ss:$16 sps:$4 sm:$0xff]  }
  0x98   :  { %3270 = vmatpush1.bf16.msra.mxu1 %v5425_v42  ;;  %v5501_v42 = vld [vmem:[#allocation6 + $0x4e4] ss:$16 sps:$4 sm:$0xff]   ;;  %v5535_v6 = vld [vmem:[#allocation6 + $0x5a0] ss:$16 sps:$4 sm:$0xff]  }
  0x99   :  { %3313 = vmatpush1.bf16.msra.mxu0 %v5426_v43  ;;  %3271 = vmatprep.subr.bf16.mxu1 %v5427_v44  ;;  %v5504_v43 = vld [vmem:[#allocation6 + $0xec] ss:$16 sps:$4 sm:$0xff]   ;;  %v6555_v44 = vpack.c.bf16 %v128_v41, %v112_v40  ;;  %v5541_v10 = vld [vmem:[#allocation6 + $0x5c0] ss:$16 sps:$4 sm:$0xff]  }
  0x9a   :  { %3314 = vmatprep.subr.bf16.mxu0 %v5429_v45  ;;  %v5499_v45 = vld [vmem:[#allocation6 + $0x4e0] ss:$16 sps:$4 sm:$0xff]   ;;  %v5582_v40 = vld [vmem:[#allocation6 + $0x28c] ss:$16 sps:$4 sm:$0xff]  }
  0x9b   :  { %v5577_v41 = vld [vmem:[#allocation6 + $0x680] ss:$16 sps:$4 sm:$0xff]  }
  0x9c   :  { %3272 = vmatpush1.bf16.msra.mxu1 %v5431_v47  ;;  %v5507_v47 = vld [vmem:[#allocation6 + $0x504] ss:$16 sps:$4 sm:$0xff]  }
  0x9d   :  { %3315 = vmatpush1.bf16.msra.mxu0 %v5432_v48  ;;  %3273 = vmatprep.subr.bf16.mxu1 %v5433_v53  ;;  %v5510_v48 = vld [vmem:[#allocation6 + $0x10c] ss:$16 sps:$4 sm:$0xff]   ;;  %v5511_v53 = vld [vmem:[#allocation6 + $0x520] ss:$16 sps:$4 sm:$0xff]  }
  0x9e   :  { %3316 = vmatprep.subr.bf16.mxu0 %v5435_v54  ;;  %v5514_v54 = vld [vmem:[#allocation6 + $0x128] ss:$16 sps:$4 sm:$0xff]  }
  0xa0   :  { %3274 = vmatpush1.bf16.msra.mxu1 %v5437_v56  ;;  %v5519_v56 = vld [vmem:[#allocation6 + $0x544] ss:$16 sps:$4 sm:$0xff]  }
  0xa1   :  { %3317 = vmatpush1.bf16.msra.mxu0 %v5438_v57  ;;  %3275 = vmatprep.subr.bf16.mxu1 %v5439_v58  ;;  %v5522_v57 = vld [vmem:[#allocation6 + $0x14c] ss:$16 sps:$4 sm:$0xff]   ;;  %v5517_v58 = vld [vmem:[#allocation6 + $0x540] ss:$16 sps:$4 sm:$0xff]  }
  0xa2   :  { %3318 = vmatprep.subr.bf16.mxu0 %v5441_v59  ;;  %v5520_v59 = vld [vmem:[#allocation6 + $0x148] ss:$16 sps:$4 sm:$0xff]  }
  0xa4   :  { %3276 = vmatpush1.bf16.msra.mxu1 %v5443_v60  ;;  %v5525_v60 = vld [vmem:[#allocation6 + $0x564] ss:$16 sps:$4 sm:$0xff]  }
  0xa5   :  { %3319 = vmatpush1.bf16.msra.mxu0 %v5444_v61  ;;  %3277 = vmatprep.subr.bf16.mxu1 %v5445_v62  ;;  %v5528_v61 = vld [vmem:[#allocation6 + $0x16c] ss:$16 sps:$4 sm:$0xff]   ;;  %v5523_v62 = vld [vmem:[#allocation6 + $0x560] ss:$16 sps:$4 sm:$0xff]  }
  0xa6   :  { %3320 = vmatprep.subr.bf16.mxu0 %v5447_v63  ;;  %v5526_v63 = vld [vmem:[#allocation6 + $0x168] ss:$16 sps:$4 sm:$0xff]  }
  0xa8   :  { %3278 = vmatpush1.bf16.msra.mxu1 %v5449_v0  ;;  %v5531_v0 = vld [vmem:[#allocation6 + $0x584] ss:$16 sps:$4 sm:$0xff]  }
  0xa9   :  { %3321 = vmatpush1.bf16.msra.mxu0 %v5450_v1  ;;  %3279 = vmatprep.subr.bf16.mxu1 %v5451_v2  ;;  %v5534_v1 = vld [vmem:[#allocation6 + $0x18c] ss:$16 sps:$4 sm:$0xff]   ;;  %v5529_v2 = vld [vmem:[#allocation6 + $0x580] ss:$16 sps:$4 sm:$0xff]  }
  0xaa   :  { %3322 = vmatprep.subr.bf16.mxu0 %v5453_v3  ;;  %v5532_v3 = vld [vmem:[#allocation6 + $0x188] ss:$16 sps:$4 sm:$0xff]  }
  0xac   :  { %3280 = vmatpush1.bf16.msra.mxu1 %v5455_v4  ;;  %v5537_v4 = vld [vmem:[#allocation6 + $0x5a4] ss:$16 sps:$4 sm:$0xff]  }
  0xad   :  { %3323 = vmatpush1.bf16.msra.mxu0 %v5456_v5  ;;  %3593 = vmatprep.subr.bf16.mxu1 %v5462_v11  ;;  %v5540_v5 = vld [vmem:[#allocation6 + $0x1ac] ss:$16 sps:$4 sm:$0xff]   ;;  %v5544_v11 = vld [vmem:[#allocation6 + $0x1c8] ss:$16 sps:$4 sm:$0xff]  }
  0xae   :  { %3335 = vmatprep.subr.bf16.mxu0 %v5459_v8  ;;  %v5543_v8 = vld [vmem:[#allocation6 + $0x5c4] ss:$16 sps:$4 sm:$0xff]  }
  0xaf   :  { %3282 = vmatmul.mubr.bf16.vlgmr.msra.gmra.mrb[0].mxu1 %v6548_v12 }
  0xb0   :  { %3325 = vmatmul.mubr.bf16.vlgmr.msra.gmra.mrb[0].mxu0 %v6550_v15  ;;  %3594 = vmatpush1.bf16.msra.mxu1 %v5460_v14  ;;  %v5552_v14 = vld [vmem:[#allocation6 + $0x1ec] ss:$16 sps:$4 sm:$0xff]  }
  0xb1   :  { %3336 = vmatpush1.bf16.msra.mxu0 %v5457_v13  ;;  %3595 = vmatprep.subr.bf16.mxu1 %v5468_v17  ;;  %v5549_v13 = vld [vmem:[#allocation6 + $0x5e4] ss:$16 sps:$4 sm:$0xff]   ;;  %v5550_v17 = vld [vmem:[#allocation6 + $0x1e8] ss:$16 sps:$4 sm:$0xff]  }
  0xb2   :  { %3337 = vmatprep.subr.bf16.mxu0 %v5465_v16  ;;  %3625 = vmatprep.mubr.bf16.mxu1 %v6542_v50  ;;  %v5508_v50 = vld [vmem:[#allocation6 + $0x108] ss:$16 sps:$4 sm:$0xff]   ;;  %v5547_v16 = vld [vmem:[#allocation6 + $0x5e0] ss:$16 sps:$4 sm:$0xff]  }
  0xb3   :  { %3367 = vmatprep.mubr.bf16.mxu0 %v6555_v44 }
  0xb4   :  { %3596 = vmatpush1.bf16.msra.mxu1 %v5466_v19  ;;  %v111_v19 = vld [vmem:[#allocation3 + $0x20] sm:$0xff] }
  0xb5   :  { %3338 = vmatpush1.bf16.msra.mxu0 %v5463_v18  ;;  %3597 = vmatprep.subr.bf16.mxu1 %v5474_v21  ;;  %v5555_v18 = vld [vmem:[#allocation6 + $0x604] ss:$16 sps:$4 sm:$0xff]   ;;  %v5558_v21 = vld [vmem:[#allocation6 + $0x20c] ss:$16 sps:$4 sm:$0xff]  }
  0xb6   :  { %3339 = vmatprep.subr.bf16.mxu0 %v5471_v20  ;;  %v127_v20 = vld [vmem:[#allocation3 + $0xa0] sm:$0xff] }
  0xb8   :  { %3598 = vmatpush1.bf16.msra.mxu1 %v5472_v23  ;;  %v5556_v23 = vld [vmem:[#allocation6 + $0x208] ss:$16 sps:$4 sm:$0xff]  }
  0xb9   :  { %3340 = vmatpush1.bf16.msra.mxu0 %v5469_v22  ;;  %3599 = vmatprep.subr.bf16.mxu1 %v5480_v25  ;;  %v5553_v22 = vld [vmem:[#allocation6 + $0x600] ss:$16 sps:$4 sm:$0xff]   ;;  %v5561_v25 = vld [vmem:[#allocation6 + $0x624] ss:$16 sps:$4 sm:$0xff]  }
  0xba   :  { %3341 = vmatprep.subr.bf16.mxu0 %v5477_v24  ;;  %v6558_v24 = vpack.c.bf16 %v127_v20, %v111_v19  ;;  %v5642_v19 = vld [vmem:[#allocation6 + $0x3cc] ss:$16 sps:$4 sm:$0xff]   ;;  %v5637_v20 = vld [vmem:[#allocation6 + $0x7c0] ss:$16 sps:$4 sm:$0xff]  }
  0xbc   :  { %3600 = vmatpush1.bf16.msra.mxu1 %v5478_v27  ;;  %v5559_v27 = vld [vmem:[#allocation6 + $0x620] ss:$16 sps:$4 sm:$0xff]  }
  0xbd   :  { %3342 = vmatpush1.bf16.msra.mxu0 %v5475_v26  ;;  %3601 = vmatprep.subr.bf16.mxu1 %v5486_v29  ;;  %v5564_v26 = vld [vmem:[#allocation6 + $0x22c] ss:$16 sps:$4 sm:$0xff]  }
  0xbe   :  { %3343 = vmatprep.subr.bf16.mxu0 %v5483_v28  ;;  %v5562_v28 = vld [vmem:[#allocation6 + $0x228] ss:$16 sps:$4 sm:$0xff]  }
  0xbf   :  { %v114_v29 = vld [vmem:[#allocation3 + $0x38] sm:$0xff] }
  0xc0   :  { %3602 = vmatpush1.bf16.msra.mxu1 %v5484_v31  ;;  %v5567_v31 = vld [vmem:[#allocation6 + $0x644] ss:$16 sps:$4 sm:$0xff]  }
  0xc1   :  { %3344 = vmatpush1.bf16.msra.mxu0 %v5481_v30  ;;  %3603 = vmatprep.subr.bf16.mxu1 %v5492_v33  ;;  %v130_v30 = vld [vmem:[#allocation3 + $0xb8] sm:$0xff] }
  0xc2   :  { %3345 = vmatprep.subr.bf16.mxu0 %v5489_v32  ;;  %v5570_v32 = vld [vmem:[#allocation6 + $0x24c] ss:$16 sps:$4 sm:$0xff]   ;;  %v6562_v33 = vpack.c.bf16 %v130_v30, %v114_v29  ;;  %v129_v29 = vld [vmem:[#allocation3 + $0xb0] sm:$0xff] }
  0xc3   :  { %v5654_v30 = vld [vmem:[#allocation6 + $0x40c] ss:$16 sps:$4 sm:$0xff]  }
  0xc4   :  { %3604 = vmatpush1.bf16.msra.mxu1 %v5490_v35  ;;  %v5568_v35 = vld [vmem:[#allocation6 + $0x248] ss:$16 sps:$4 sm:$0xff]  }
  0xc5   :  { %3346 = vmatpush1.bf16.msra.mxu0 %v5487_v34  ;;  %3605 = vmatprep.subr.bf16.mxu1 %v5498_v37  ;;  %v5565_v34 = vld [vmem:[#allocation6 + $0x640] ss:$16 sps:$4 sm:$0xff]  }
  0xc6   :  { %3347 = vmatprep.subr.bf16.mxu0 %v5495_v36  ;;  %v5576_v36 = vld [vmem:[#allocation6 + $0x26c] ss:$16 sps:$4 sm:$0xff]   ;;  %v5571_v37 = vld [vmem:[#allocation6 + $0x660] ss:$16 sps:$4 sm:$0xff]  }
  0xc8   :  { %3606 = vmatpush1.bf16.msra.mxu1 %v5496_v39  ;;  %v5579_v39 = vld [vmem:[#allocation6 + $0x684] ss:$16 sps:$4 sm:$0xff]  }
  0xc9   :  { %3348 = vmatpush1.bf16.msra.mxu0 %v5493_v38  ;;  %3607 = vmatprep.subr.bf16.mxu1 %v5504_v43  ;;  %v5574_v38 = vld [vmem:[#allocation6 + $0x268] ss:$16 sps:$4 sm:$0xff]   ;;  %v5588_v43 = vld [vmem:[#allocation6 + $0x2ac] ss:$16 sps:$4 sm:$0xff]  }
  0xca   :  { %3349 = vmatprep.subr.bf16.mxu0 %v5501_v42  ;;  %v5585_v42 = vld [vmem:[#allocation6 + $0x6a4] ss:$16 sps:$4 sm:$0xff]  }
  0xcc   :  { %3608 = vmatpush1.bf16.msra.mxu1 %v5502_v46  ;;  %v5586_v46 = vld [vmem:[#allocation6 + $0x2a8] ss:$16 sps:$4 sm:$0xff]  }
  0xcd   :  { %3350 = vmatpush1.bf16.msra.mxu0 %v5499_v45  ;;  %3609 = vmatprep.subr.bf16.mxu1 %v5510_v48  ;;  %v5583_v45 = vld [vmem:[#allocation6 + $0x6a0] ss:$16 sps:$4 sm:$0xff]   ;;  %v5594_v48 = vld [vmem:[#allocation6 + $0x2cc] ss:$16 sps:$4 sm:$0xff]  }
  0xce   :  { %3351 = vmatprep.subr.bf16.mxu0 %v5507_v47  ;;  %v5591_v47 = vld [vmem:[#allocation6 + $0x6c4] ss:$16 sps:$4 sm:$0xff]  }
  0xd0   :  { %3610 = vmatpush1.bf16.msra.mxu1 %v5508_v50  ;;  %v5592_v50 = vld [vmem:[#allocation6 + $0x2c8] ss:$16 sps:$4 sm:$0xff]  }
  0xd1   :  { %3352 = vmatpush1.bf16.msra.mxu0 %v5505_v49  ;;  %3611 = vmatprep.subr.bf16.mxu1 %v5516_v52  ;;  %v5589_v49 = vld [vmem:[#allocation6 + $0x6c0] ss:$16 sps:$4 sm:$0xff]   ;;  %v5600_v52 = vld [vmem:[#allocation6 + $0x2ec] ss:$16 sps:$4 sm:$0xff]  }
  0xd2   :  { %3353 = vmatprep.subr.bf16.mxu0 %v5513_v51  ;;  %v5597_v51 = vld [vmem:[#allocation6 + $0x6e4] ss:$16 sps:$4 sm:$0xff]  }
  0xd4   :  { %3612 = vmatpush1.bf16.msra.mxu1 %v5514_v54  ;;  %v5598_v54 = vld [vmem:[#allocation6 + $0x2e8] ss:$16 sps:$4 sm:$0xff]  }
  0xd5   :  { %3354 = vmatpush1.bf16.msra.mxu0 %v5511_v53  ;;  %3613 = vmatprep.subr.bf16.mxu1 %v5522_v57  ;;  %v5595_v53 = vld [vmem:[#allocation6 + $0x6e0] ss:$16 sps:$4 sm:$0xff]   ;;  %v5606_v57 = vld [vmem:[#allocation6 + $0x30c] ss:$16 sps:$4 sm:$0xff]  }
  0xd6   :  { %3355 = vmatprep.subr.bf16.mxu0 %v5519_v56  ;;  %v5603_v56 = vld [vmem:[#allocation6 + $0x704] ss:$16 sps:$4 sm:$0xff]  }
  0xd8   :  { %3614 = vmatpush1.bf16.msra.mxu1 %v5520_v59  ;;  %v5604_v59 = vld [vmem:[#allocation6 + $0x308] ss:$16 sps:$4 sm:$0xff]  }
  0xd9   :  { %3356 = vmatpush1.bf16.msra.mxu0 %v5517_v58  ;;  %3615 = vmatprep.subr.bf16.mxu1 %v5528_v61  ;;  %v5601_v58 = vld [vmem:[#allocation6 + $0x700] ss:$16 sps:$4 sm:$0xff]   ;;  %v5612_v61 = vld [vmem:[#allocation6 + $0x32c] ss:$16 sps:$4 sm:$0xff]  }
  0xda   :  { %3357 = vmatprep.subr.bf16.mxu0 %v5525_v60  ;;  %v5609_v60 = vld [vmem:[#allocation6 + $0x724] ss:$16 sps:$4 sm:$0xff]  }
  0xdc   :  { %3616 = vmatpush1.bf16.msra.mxu1 %v5526_v63  ;;  %v5610_v63 = vld [vmem:[#allocation6 + $0x328] ss:$16 sps:$4 sm:$0xff]  }
  0xdd   :  { %3358 = vmatpush1.bf16.msra.mxu0 %v5523_v62  ;;  %3617 = vmatprep.subr.bf16.mxu1 %v5534_v1  ;;  %v5607_v62 = vld [vmem:[#allocation6 + $0x720] ss:$16 sps:$4 sm:$0xff]   ;;  %v5618_v1 = vld [vmem:[#allocation6 + $0x34c] ss:$16 sps:$4 sm:$0xff]  }
  0xde   :  { %3359 = vmatprep.subr.bf16.mxu0 %v5531_v0  ;;  %v5615_v0 = vld [vmem:[#allocation6 + $0x744] ss:$16 sps:$4 sm:$0xff]  }
  0xe0   :  { %3618 = vmatpush1.bf16.msra.mxu1 %v5532_v3  ;;  %v5616_v3 = vld [vmem:[#allocation6 + $0x348] ss:$16 sps:$4 sm:$0xff]  }
  0xe1   :  { %3360 = vmatpush1.bf16.msra.mxu0 %v5529_v2  ;;  %3619 = vmatprep.subr.bf16.mxu1 %v5540_v5  ;;  %v5613_v2 = vld [vmem:[#allocation6 + $0x740] ss:$16 sps:$4 sm:$0xff]   ;;  %v5624_v5 = vld [vmem:[#allocation6 + $0x36c] ss:$16 sps:$4 sm:$0xff]  }
  0xe2   :  { %3361 = vmatprep.subr.bf16.mxu0 %v5537_v4  ;;  %v5621_v4 = vld [vmem:[#allocation6 + $0x764] ss:$16 sps:$4 sm:$0xff]  }
  0xe4   :  { %3620 = vmatpush1.bf16.msra.mxu1 %v5538_v7  ;;  %v5622_v7 = vld [vmem:[#allocation6 + $0x368] ss:$16 sps:$4 sm:$0xff]  }
  0xe5   :  { %3362 = vmatpush1.bf16.msra.mxu0 %v5535_v6  ;;  %3621 = vmatprep.subr.bf16.mxu1 %v5546_v9  ;;  %v5619_v6 = vld [vmem:[#allocation6 + $0x760] ss:$16 sps:$4 sm:$0xff]   ;;  %v5630_v9 = vld [vmem:[#allocation6 + $0x38c] ss:$16 sps:$4 sm:$0xff]  }
  0xe6   :  { %3363 = vmatprep.subr.bf16.mxu0 %v5543_v8  ;;  %v5627_v8 = vld [vmem:[#allocation6 + $0x784] ss:$16 sps:$4 sm:$0xff]  }
  0xe8   :  { %3622 = vmatpush1.bf16.msra.mxu1 %v5544_v11  ;;  %v5628_v11 = vld [vmem:[#allocation6 + $0x388] ss:$16 sps:$4 sm:$0xff]  }
  0xe9   :  { %3364 = vmatpush1.bf16.msra.mxu0 %v5541_v10  ;;  %3623 = vmatprep.subr.bf16.mxu1 %v5552_v14  ;;  %v5625_v10 = vld [vmem:[#allocation6 + $0x780] ss:$16 sps:$4 sm:$0xff]   ;;  %v5636_v14 = vld [vmem:[#allocation6 + $0x3ac] ss:$16 sps:$4 sm:$0xff]  }
  0xea   :  { %3365 = vmatprep.subr.bf16.mxu0 %v5549_v13  ;;  %v5633_v13 = vld [vmem:[#allocation6 + $0x7a4] ss:$16 sps:$4 sm:$0xff]  }
  0xec   :  { %3624 = vmatpush1.bf16.msra.mxu1 %v5550_v17  ;;  %v5634_v17 = vld [vmem:[#allocation6 + $0x3a8] ss:$16 sps:$4 sm:$0xff]  }
  0xed   :  { %3366 = vmatpush1.bf16.msra.mxu0 %v5547_v16  ;;  %3636 = vmatprep.subr.bf16.mxu1 %v5558_v21  ;;  %v5631_v16 = vld [vmem:[#allocation6 + $0x7a0] ss:$16 sps:$4 sm:$0xff]   ;;  %v5640_v21 = vld [vmem:[#allocation6 + $0x3c8] ss:$16 sps:$4 sm:$0xff]  }
  0xee   :  { %3378 = vmatprep.subr.bf16.mxu0 %v5555_v18  ;;  %v5639_v18 = vld [vmem:[#allocation6 + $0x7c4] ss:$16 sps:$4 sm:$0xff]  }
  0xef   :  { %3626 = vmatmul.mubr.bf16.vlgmr.msra.gmra.mrb[4].mxu1 %v6548_v12  ;;  %v5573_v12 = vld [vmem:[#allocation6 + $0x664] ss:$16 sps:$4 sm:$0xff]  }
  0xf0   :  { %3368 = vmatmul.mubr.bf16.vlgmr.msra.gmra.mrb[0].mxu0 %v6558_v24  ;;  %3637 = vmatpush1.bf16.msra.mxu1 %v5556_v23  ;;  %v5648_v23 = vld [vmem:[#allocation6 + $0x3ec] ss:$16 sps:$4 sm:$0xff]  }
  0xf1   :  { %3379 = vmatpush1.bf16.msra.mxu0 %v5553_v22  ;;  %3638 = vmatprep.subr.bf16.mxu1 %v5564_v26  ;;  %v5645_v22 = vld [vmem:[#allocation6 + $0x7e4] ss:$16 sps:$4 sm:$0xff]   ;;  %v5646_v26 = vld [vmem:[#allocation6 + $0x3e8] ss:$16 sps:$4 sm:$0xff]  }
  0xf2   :  { %3380 = vmatprep.subr.bf16.mxu0 %v5561_v25  ;;  %3668 = vmatprep.mubr.bf16.mxu1 %v6544_v55  ;;  %v5580_v55 = vld [vmem:[#allocation6 + $0x288] ss:$16 sps:$4 sm:$0xff]   ;;  %v5643_v25 = vld [vmem:[#allocation6 + $0x7e0] ss:$16 sps:$4 sm:$0xff]  }
  0xf3   :  { %3410 = vmatprep.mubr.bf16.mxu0 %v6562_v33 }
  0xf4   :  { %3639 = vmatpush1.bf16.msra.mxu1 %v5562_v28  ;;  %v113_v28 = vld [vmem:[#allocation3 + $0x30] sm:$0xff] }
  0xf5   :  { %3381 = vmatpush1.bf16.msra.mxu0 %v5559_v27  ;;  %3640 = vmatprep.subr.bf16.mxu1 %v5570_v32  ;;  %v5651_v27 = vld [vmem:[#allocation6 + $0x804] ss:$16 sps:$4 sm:$0xff]   ;;  %v116_v32 = vld [vmem:[#allocation3 + $0x48] sm:$0xff] }
  0xf6   :  { %3382 = vmatprep.subr.bf16.mxu0 %v5567_v31  ;;  %v5649_v31 = vld [vmem:[#allocation6 + $0x800] ss:$16 sps:$4 sm:$0xff]  }
  0xf8   :  { %3641 = vmatpush1.bf16.msra.mxu1 %v5568_v35  ;;  %v132_v35 = vld [vmem:[#allocation3 + $0xc8] sm:$0xff] }
  0xf9   :  { %3383 = vmatpush1.bf16.msra.mxu0 %v5565_v34  ;;  %3642 = vmatprep.subr.bf16.mxu1 %v5576_v36  ;;  %v6566_v34 = vpack.c.bf16 %v129_v29, %v113_v28  ;;  %v5657_v36 = vld [vmem:[#allocation6 + $0x824] ss:$16 sps:$4 sm:$0xff]   ;;  %v5738_v28 = vld [vmem:[#allocation6 + $0x5cc] ss:$16 sps:$4 sm:$0xff]   ;;  %v5733_v29 = vld [vmem:[#allocation6 + $0x9c0] ss:$16 sps:$4 sm:$0xff]  }
  0xfa   :  { %3384 = vmatprep.subr.bf16.mxu0 %v5573_v12  ;;  %v5652_v12 = vld [vmem:[#allocation6 + $0x408] ss:$16 sps:$4 sm:$0xff]  }
  0xfc   :  { %3643 = vmatpush1.bf16.msra.mxu1 %v5574_v38  ;;  %v6568_v38 = vpack.c.bf16 %v132_v35, %v116_v32  ;;  %v5744_v32 = vld [vmem:[#allocation6 + $0x5ec] ss:$16 sps:$4 sm:$0xff]   ;;  %v5739_v35 = vld [vmem:[#allocation6 + $0x9e0] ss:$16 sps:$4 sm:$0xff]  }
  0xfd   :  { %3385 = vmatpush1.bf16.msra.mxu0 %v5571_v37  ;;  %3644 = vmatprep.subr.bf16.mxu1 %v5582_v40  ;;  %v5660_v37 = vld [vmem:[#allocation6 + $0x42c] ss:$16 sps:$4 sm:$0xff]   ;;  %v5658_v40 = vld [vmem:[#allocation6 + $0x428] ss:$16 sps:$4 sm:$0xff]  }
  0xfe   :  { %3386 = vmatprep.subr.bf16.mxu0 %v5579_v39  ;;  %v5655_v39 = vld [vmem:[#allocation6 + $0x820] ss:$16 sps:$4 sm:$0xff]  }
 0x100   :  { %3645 = vmatpush1.bf16.msra.mxu1 %v5580_v55  ;;  %v5666_v55 = vld [vmem:[#allocation6 + $0x44c] ss:$16 sps:$4 sm:$0xff]  }
 0x101   :  { %3387 = vmatpush1.bf16.msra.mxu0 %v5577_v41  ;;  %3646 = vmatprep.subr.bf16.mxu1 %v5588_v43  ;;  %v5663_v41 = vld [vmem:[#allocation6 + $0x844] ss:$16 sps:$4 sm:$0xff]   ;;  %v5664_v43 = vld [vmem:[#allocation6 + $0x448] ss:$16 sps:$4 sm:$0xff]  }
 0x102   :  { %3388 = vmatprep.subr.bf16.mxu0 %v5585_v42  ;;  %v5661_v42 = vld [vmem:[#allocation6 + $0x840] ss:$16 sps:$4 sm:$0xff]  }
 0x104   :  { %3647 = vmatpush1.bf16.msra.mxu1 %v5586_v46  ;;  %v5667_v46 = vld [vmem:[#allocation6 + $0x860] ss:$16 sps:$4 sm:$0xff]  }
 0x105   :  { %3389 = vmatpush1.bf16.msra.mxu0 %v5583_v45  ;;  %3648 = vmatprep.subr.bf16.mxu1 %v5594_v48  ;;  %v5669_v45 = vld [vmem:[#allocation6 + $0x864] ss:$16 sps:$4 sm:$0xff]  }
 0x106   :  { %3390 = vmatprep.subr.bf16.mxu0 %v5591_v47  ;;  %v5670_v47 = vld [vmem:[#allocation6 + $0x468] ss:$16 sps:$4 sm:$0xff]   ;;  %v5675_v48 = vld [vmem:[#allocation6 + $0x884] ss:$16 sps:$4 sm:$0xff]  }
 0x108   :  { %3649 = vmatpush1.bf16.msra.mxu1 %v5592_v50  ;;  %v5673_v50 = vld [vmem:[#allocation6 + $0x880] ss:$16 sps:$4 sm:$0xff]  }
 0x109   :  { %3391 = vmatpush1.bf16.msra.mxu0 %v5589_v49  ;;  %3650 = vmatprep.subr.bf16.mxu1 %v5600_v52  ;;  %v5678_v49 = vld [vmem:[#allocation6 + $0x48c] ss:$16 sps:$4 sm:$0xff]  }
 0x10a   :  { %3392 = vmatprep.subr.bf16.mxu0 %v5597_v51  ;;  %v5681_v51 = vld [vmem:[#allocation6 + $0x8a4] ss:$16 sps:$4 sm:$0xff]   ;;  %v5684_v52 = vld [vmem:[#allocation6 + $0x4ac] ss:$16 sps:$4 sm:$0xff]  }
 0x10c   :  { %3651 = vmatpush1.bf16.msra.mxu1 %v5598_v54  ;;  %v5682_v54 = vld [vmem:[#allocation6 + $0x4a8] ss:$16 sps:$4 sm:$0xff]  }
 0x10d   :  { %3393 = vmatpush1.bf16.msra.mxu0 %v5595_v53  ;;  %3652 = vmatprep.subr.bf16.mxu1 %v5606_v57  ;;  %v5679_v53 = vld [vmem:[#allocation6 + $0x8a0] ss:$16 sps:$4 sm:$0xff]   ;;  %v5690_v57 = vld [vmem:[#allocation6 + $0x4cc] ss:$16 sps:$4 sm:$0xff]  }
 0x10e   :  { %3394 = vmatprep.subr.bf16.mxu0 %v5603_v56  ;;  %v5687_v56 = vld [vmem:[#allocation6 + $0x8c4] ss:$16 sps:$4 sm:$0xff]  }
 0x110   :  { %3653 = vmatpush1.bf16.msra.mxu1 %v5604_v59  ;;  %v5688_v59 = vld [vmem:[#allocation6 + $0x4c8] ss:$16 sps:$4 sm:$0xff]  }
 0x111   :  { %3395 = vmatpush1.bf16.msra.mxu0 %v5601_v58  ;;  %3654 = vmatprep.subr.bf16.mxu1 %v5612_v61  ;;  %v5685_v58 = vld [vmem:[#allocation6 + $0x8c0] ss:$16 sps:$4 sm:$0xff]   ;;  %v5696_v61 = vld [vmem:[#allocation6 + $0x4ec] ss:$16 sps:$4 sm:$0xff]  }
 0x112   :  { %3396 = vmatprep.subr.bf16.mxu0 %v5609_v60  ;;  %v5693_v60 = vld [vmem:[#allocation6 + $0x8e4] ss:$16 sps:$4 sm:$0xff]  }
 0x114   :  { %3655 = vmatpush1.bf16.msra.mxu1 %v5610_v63  ;;  %v5694_v63 = vld [vmem:[#allocation6 + $0x4e8] ss:$16 sps:$4 sm:$0xff]  }
 0x115   :  { %3397 = vmatpush1.bf16.msra.mxu0 %v5607_v62  ;;  %3656 = vmatprep.subr.bf16.mxu1 %v5618_v1  ;;  %v5691_v62 = vld [vmem:[#allocation6 + $0x8e0] ss:$16 sps:$4 sm:$0xff]   ;;  %v5702_v1 = vld [vmem:[#allocation6 + $0x50c] ss:$16 sps:$4 sm:$0xff]  }
 0x116   :  { %3398 = vmatprep.subr.bf16.mxu0 %v5615_v0  ;;  %v5699_v0 = vld [vmem:[#allocation6 + $0x904] ss:$16 sps:$4 sm:$0xff]  }
 0x118   :  { %3657 = vmatpush1.bf16.msra.mxu1 %v5616_v3  ;;  %v5700_v3 = vld [vmem:[#allocation6 + $0x508] ss:$16 sps:$4 sm:$0xff]  }
 0x119   :  { %3399 = vmatpush1.bf16.msra.mxu0 %v5613_v2  ;;  %3658 = vmatprep.subr.bf16.mxu1 %v5624_v5  ;;  %v5697_v2 = vld [vmem:[#allocation6 + $0x900] ss:$16 sps:$4 sm:$0xff]   ;;  %v5708_v5 = vld [vmem:[#allocation6 + $0x52c] ss:$16 sps:$4 sm:$0xff]  }
 0x11a   :  { %3400 = vmatprep.subr.bf16.mxu0 %v5621_v4  ;;  %v5705_v4 = vld [vmem:[#allocation6 + $0x924] ss:$16 sps:$4 sm:$0xff]  }
 0x11c   :  { %3659 = vmatpush1.bf16.msra.mxu1 %v5622_v7  ;;  %v5706_v7 = vld [vmem:[#allocation6 + $0x528] ss:$16 sps:$4 sm:$0xff]  }
 0x11d   :  { %3401 = vmatpush1.bf16.msra.mxu0 %v5619_v6  ;;  %3660 = vmatprep.subr.bf16.mxu1 %v5630_v9  ;;  %v5703_v6 = vld [vmem:[#allocation6 + $0x920] ss:$16 sps:$4 sm:$0xff]   ;;  %v5714_v9 = vld [vmem:[#allocation6 + $0x54c] ss:$16 sps:$4 sm:$0xff]  }
 0x11e   :  { %3402 = vmatprep.subr.bf16.mxu0 %v5627_v8  ;;  %v5711_v8 = vld [vmem:[#allocation6 + $0x944] ss:$16 sps:$4 sm:$0xff]  }
 0x120   :  { %3661 = vmatpush1.bf16.msra.mxu1 %v5628_v11  ;;  %v5712_v11 = vld [vmem:[#allocation6 + $0x548] ss:$16 sps:$4 sm:$0xff]  }
 0x121   :  { %3403 = vmatpush1.bf16.msra.mxu0 %v5625_v10  ;;  %3662 = vmatprep.subr.bf16.mxu1 %v5636_v14  ;;  %v5709_v10 = vld [vmem:[#allocation6 + $0x940] ss:$16 sps:$4 sm:$0xff]   ;;  %v5720_v14 = vld [vmem:[#allocation6 + $0x56c] ss:$16 sps:$4 sm:$0xff]  }
 0x122   :  { %3404 = vmatprep.subr.bf16.mxu0 %v5633_v13  ;;  %v5717_v13 = vld [vmem:[#allocation6 + $0x964] ss:$16 sps:$4 sm:$0xff]  }
 0x124   :  { %3663 = vmatpush1.bf16.msra.mxu1 %v5634_v17  ;;  %v5718_v17 = vld [vmem:[#allocation6 + $0x568] ss:$16 sps:$4 sm:$0xff]  }
 0x125   :  { %3405 = vmatpush1.bf16.msra.mxu0 %v5631_v16  ;;  %3664 = vmatprep.subr.bf16.mxu1 %v5642_v19  ;;  %v5715_v16 = vld [vmem:[#allocation6 + $0x960] ss:$16 sps:$4 sm:$0xff]   ;;  %v5726_v19 = vld [vmem:[#allocation6 + $0x58c] ss:$16 sps:$4 sm:$0xff]  }
 0x126   :  { %3406 = vmatprep.subr.bf16.mxu0 %v5639_v18  ;;  %v5723_v18 = vld [vmem:[#allocation6 + $0x984] ss:$16 sps:$4 sm:$0xff]  }
 0x128   :  { %3665 = vmatpush1.bf16.msra.mxu1 %v5640_v21  ;;  %v5724_v21 = vld [vmem:[#allocation6 + $0x588] ss:$16 sps:$4 sm:$0xff]  }
 0x129   :  { %3407 = vmatpush1.bf16.msra.mxu0 %v5637_v20  ;;  %3666 = vmatprep.subr.bf16.mxu1 %v5648_v23  ;;  %v5721_v20 = vld [vmem:[#allocation6 + $0x980] ss:$16 sps:$4 sm:$0xff]   ;;  %v5732_v23 = vld [vmem:[#allocation6 + $0x5ac] ss:$16 sps:$4 sm:$0xff]  }
 0x12a   :  { %3408 = vmatprep.subr.bf16.mxu0 %v5645_v22  ;;  %v5729_v22 = vld [vmem:[#allocation6 + $0x9a4] ss:$16 sps:$4 sm:$0xff]  }
 0x12c   :  { %3667 = vmatpush1.bf16.msra.mxu1 %v5646_v26  ;;  %v5730_v26 = vld [vmem:[#allocation6 + $0x5a8] ss:$16 sps:$4 sm:$0xff]  }
 0x12d   :  { %3409 = vmatpush1.bf16.msra.mxu0 %v5643_v25  ;;  %3679 = vmatprep.subr.bf16.mxu1 %v5654_v30  ;;  %v5727_v25 = vld [vmem:[#allocation6 + $0x9a0] ss:$16 sps:$4 sm:$0xff]   ;;  %v5736_v30 = vld [vmem:[#allocation6 + $0x5c8] ss:$16 sps:$4 sm:$0xff]  }
 0x12e   :  { %3421 = vmatprep.subr.bf16.mxu0 %v5651_v27  ;;  %v5735_v27 = vld [vmem:[#allocation6 + $0x9c4] ss:$16 sps:$4 sm:$0xff]  }
 0x12f   :  { %3669 = vmatmul.mubr.bf16.vlgmr.msra.gmra.mrb[4].mxu1 %v6550_v15  ;;  %v5672_v15 = vld [vmem:[#allocation6 + $0x46c] ss:$16 sps:$4 sm:$0xff]  }
 0x130   :  { %3411 = vmatmul.mubr.bf16.vlgmr.msra.gmra.mrb[0].mxu0 %v6566_v34  ;;  %3680 = vmatpush1.bf16.msra.mxu1 %v5652_v12  ;;  %v5742_v12 = vld [vmem:[#allocation6 + $0x5e8] ss:$16 sps:$4 sm:$0xff]  }
 0x131   :  { %3422 = vmatpush1.bf16.msra.mxu0 %v5649_v31  ;;  %3681 = vmatprep.subr.bf16.mxu1 %v5660_v37  ;;  %v5741_v31 = vld [vmem:[#allocation6 + $0x9e4] ss:$16 sps:$4 sm:$0xff]  }
 0x132   :  { %3423 = vmatprep.subr.bf16.mxu0 %v5657_v36  ;;  %3453 = vmatprep.mubr.bf16.mxu0 %v6568_v38  ;;  %v115_v36 = vld [vmem:[#allocation3 + $0x40] sm:$0xff] }
 0x133   :  { %3711 = vmatprep.mubr.bf16.mxu1 %v6555_v44  ;;  %v5676_v44 = vld [vmem:[#allocation6 + $0x488] ss:$16 sps:$4 sm:$0xff]   ;;  %v131_v37 = vld [vmem:[#allocation3 + $0xc0] sm:$0xff] }
 0x134   :  { %3682 = vmatpush1.bf16.msra.mxu1 %v5658_v40  ;;  %v5750_v40 = vld [vmem:[#allocation6 + $0x60c] ss:$16 sps:$4 sm:$0xff]  }
 0x135   :  { %3424 = vmatpush1.bf16.msra.mxu0 %v5655_v39  ;;  %3683 = vmatprep.subr.bf16.mxu1 %v5666_v55  ;;  %v5747_v39 = vld [vmem:[#allocation6 + $0xa04] ss:$16 sps:$4 sm:$0xff]   ;;  %v118_v55 = vld [vmem:[#allocation3 + $0x58] sm:$0xff] }
 0x136   :  { %3425 = vmatprep.subr.bf16.mxu0 %v5663_v41  ;;  %v5745_v41 = vld [vmem:[#allocation6 + $0xa00] ss:$16 sps:$4 sm:$0xff]  }
 0x138   :  { %3684 = vmatpush1.bf16.msra.mxu1 %v5664_v43  ;;  %v134_v43 = vld [vmem:[#allocation3 + $0xd8] sm:$0xff] }
 0x139   :  { %3426 = vmatpush1.bf16.msra.mxu0 %v5661_v42  ;;  %3685 = vmatprep.subr.bf16.mxu1 %v5672_v15  ;;  %v6574_v42 = vpack.c.bf16 %v131_v37, %v115_v36  ;;  %v5753_v15 = vld [vmem:[#allocation6 + $0xa24] ss:$16 sps:$4 sm:$0xff]   ;;  %v5828_v37 = vld [vmem:[#allocation6 + $0x7ac] ss:$16 sps:$4 sm:$0xff]  }
 0x13a   :  { %3427 = vmatprep.subr.bf16.mxu0 %v5669_v45  ;;  %v5748_v45 = vld [vmem:[#allocation6 + $0x608] ss:$16 sps:$4 sm:$0xff]   ;;  %v5825_v36 = vld [vmem:[#allocation6 + $0xba4] ss:$16 sps:$4 sm:$0xff]  }
 0x13c   :  { %3686 = vmatpush1.bf16.msra.mxu1 %v5670_v47  ;;  %v6576_v47 = vpack.c.bf16 %v134_v43, %v118_v55  ;;  %v5834_v55 = vld [vmem:[#allocation6 + $0x7cc] ss:$16 sps:$4 sm:$0xff]   ;;  %v5829_v43 = vld [vmem:[#allocation6 + $0xbc0] ss:$16 sps:$4 sm:$0xff]  }
 0x13d   :  { %3428 = vmatpush1.bf16.msra.mxu0 %v5667_v46  ;;  %3687 = vmatprep.subr.bf16.mxu1 %v5678_v49  ;;  %v5756_v46 = vld [vmem:[#allocation6 + $0x62c] ss:$16 sps:$4 sm:$0xff]   ;;  %v5754_v49 = vld [vmem:[#allocation6 + $0x628] ss:$16 sps:$4 sm:$0xff]  }
 0x13e   :  { %3429 = vmatprep.subr.bf16.mxu0 %v5675_v48  ;;  %v5751_v48 = vld [vmem:[#allocation6 + $0xa20] ss:$16 sps:$4 sm:$0xff]  }
 0x140   :  { %3688 = vmatpush1.bf16.msra.mxu1 %v5676_v44  ;;  %v5762_v44 = vld [vmem:[#allocation6 + $0x64c] ss:$16 sps:$4 sm:$0xff]  }
 0x141   :  { %3430 = vmatpush1.bf16.msra.mxu0 %v5673_v50  ;;  %3689 = vmatprep.subr.bf16.mxu1 %v5684_v52  ;;  %v5759_v50 = vld [vmem:[#allocation6 + $0xa44] ss:$16 sps:$4 sm:$0xff]   ;;  %v5760_v52 = vld [vmem:[#allocation6 + $0x648] ss:$16 sps:$4 sm:$0xff]  }
 0x142   :  { %3431 = vmatprep.subr.bf16.mxu0 %v5681_v51  ;;  %v5757_v51 = vld [vmem:[#allocation6 + $0xa40] ss:$16 sps:$4 sm:$0xff]  }
 0x144   :  { %3690 = vmatpush1.bf16.msra.mxu1 %v5682_v54  ;;  %v5763_v54 = vld [vmem:[#allocation6 + $0xa60] ss:$16 sps:$4 sm:$0xff]  }
 0x145   :  { %3432 = vmatpush1.bf16.msra.mxu0 %v5679_v53  ;;  %3691 = vmatprep.subr.bf16.mxu1 %v5690_v57  ;;  %v5765_v53 = vld [vmem:[#allocation6 + $0xa64] ss:$16 sps:$4 sm:$0xff]  }
 0x146   :  { %3433 = vmatprep.subr.bf16.mxu0 %v5687_v56  ;;  %v5766_v56 = vld [vmem:[#allocation6 + $0x668] ss:$16 sps:$4 sm:$0xff]   ;;  %v5771_v57 = vld [vmem:[#allocation6 + $0xa84] ss:$16 sps:$4 sm:$0xff]  }
 0x148   :  { %3692 = vmatpush1.bf16.msra.mxu1 %v5688_v59  ;;  %v5769_v59 = vld [vmem:[#allocation6 + $0xa80] ss:$16 sps:$4 sm:$0xff]  }
 0x149   :  { %3434 = vmatpush1.bf16.msra.mxu0 %v5685_v58  ;;  %3693 = vmatprep.subr.bf16.mxu1 %v5696_v61  ;;  %v5774_v58 = vld [vmem:[#allocation6 + $0x68c] ss:$16 sps:$4 sm:$0xff]  }
 0x14a   :  { %3435 = vmatprep.subr.bf16.mxu0 %v5693_v60  ;;  %v5777_v60 = vld [vmem:[#allocation6 + $0xaa4] ss:$16 sps:$4 sm:$0xff]   ;;  %v5780_v61 = vld [vmem:[#allocation6 + $0x6ac] ss:$16 sps:$4 sm:$0xff]  }
 0x14c   :  { %3694 = vmatpush1.bf16.msra.mxu1 %v5694_v63  ;;  %v5778_v63 = vld [vmem:[#allocation6 + $0x6a8] ss:$16 sps:$4 sm:$0xff]  }
 0x14d   :  { %3436 = vmatpush1.bf16.msra.mxu0 %v5691_v62  ;;  %3695 = vmatprep.subr.bf16.mxu1 %v5702_v1  ;;  %v5775_v62 = vld [vmem:[#allocation6 + $0xaa0] ss:$16 sps:$4 sm:$0xff]   ;;  %v5786_v1 = vld [vmem:[#allocation6 + $0x6cc] ss:$16 sps:$4 sm:$0xff]  }
 0x14e   :  { %3437 = vmatprep.subr.bf16.mxu0 %v5699_v0  ;;  %v5783_v0 = vld [vmem:[#allocation6 + $0xac4] ss:$16 sps:$4 sm:$0xff]  }
 0x150   :  { %3696 = vmatpush1.bf16.msra.mxu1 %v5700_v3 }
 0x151   :  { %3438 = vmatpush1.bf16.msra.mxu0 %v5697_v2  ;;  %3697 = vmatprep.subr.bf16.mxu1 %v5708_v5 }
 0x152   :  { %3439 = vmatprep.subr.bf16.mxu0 %v5705_v4  ;;  %v5781_v4 = vld [vmem:[#allocation6 + $0xac0] ss:$16 sps:$4 sm:$0xff]  }
 0x154   :  { %3698 = vmatpush1.bf16.msra.mxu1 %v5706_v7 }
 0x155   :  { %3440 = vmatpush1.bf16.msra.mxu0 %v5703_v6  ;;  %3699 = vmatprep.subr.bf16.mxu1 %v5714_v9  ;;  %v5784_v6 = vld [vmem:[#allocation6 + $0x6c8] ss:$16 sps:$4 sm:$0xff]   ;;  %v5792_v9 = vld [vmem:[#allocation6 + $0x6ec] ss:$16 sps:$4 sm:$0xff]  }
 0x156   :  { %3441 = vmatprep.subr.bf16.mxu0 %v5711_v8  ;;  %v5789_v8 = vld [vmem:[#allocation6 + $0xae4] ss:$16 sps:$4 sm:$0xff]  }
 0x158   :  { %3700 = vmatpush1.bf16.msra.mxu1 %v5712_v11  ;;  %v5790_v11 = vld [vmem:[#allocation6 + $0x6e8] ss:$16 sps:$4 sm:$0xff]  }
 0x159   :  { %3442 = vmatpush1.bf16.msra.mxu0 %v5709_v10  ;;  %3701 = vmatprep.subr.bf16.mxu1 %v5720_v14  ;;  %v5787_v10 = vld [vmem:[#allocation6 + $0xae0] ss:$16 sps:$4 sm:$0xff]   ;;  %v5798_v14 = vld [vmem:[#allocation6 + $0x70c] ss:$16 sps:$4 sm:$0xff]  }
 0x15a   :  { %3443 = vmatprep.subr.bf16.mxu0 %v5717_v13  ;;  %v5795_v13 = vld [vmem:[#allocation6 + $0xb04] ss:$16 sps:$4 sm:$0xff]  }
 0x15c   :  { %3702 = vmatpush1.bf16.msra.mxu1 %v5718_v17  ;;  %v5796_v17 = vld [vmem:[#allocation6 + $0x708] ss:$16 sps:$4 sm:$0xff]  }
 0x15d   :  { %3444 = vmatpush1.bf16.msra.mxu0 %v5715_v16  ;;  %3703 = vmatprep.subr.bf16.mxu1 %v5726_v19  ;;  %v5793_v16 = vld [vmem:[#allocation6 + $0xb00] ss:$16 sps:$4 sm:$0xff]   ;;  %v5804_v19 = vld [vmem:[#allocation6 + $0x72c] ss:$16 sps:$4 sm:$0xff]  }
 0x15e   :  { %3445 = vmatprep.subr.bf16.mxu0 %v5723_v18  ;;  %v5801_v18 = vld [vmem:[#allocation6 + $0xb24] ss:$16 sps:$4 sm:$0xff]  }
 0x160   :  { %3704 = vmatpush1.bf16.msra.mxu1 %v5724_v21  ;;  %v5802_v21 = vld [vmem:[#allocation6 + $0x728] ss:$16 sps:$4 sm:$0xff]  }
 0x161   :  { %3446 = vmatpush1.bf16.msra.mxu0 %v5721_v20  ;;  %3705 = vmatprep.subr.bf16.mxu1 %v5732_v23  ;;  %v5799_v20 = vld [vmem:[#allocation6 + $0xb20] ss:$16 sps:$4 sm:$0xff]   ;;  %v5810_v23 = vld [vmem:[#allocation6 + $0x74c] ss:$16 sps:$4 sm:$0xff]  }
 0x162   :  { %3447 = vmatprep.subr.bf16.mxu0 %v5729_v22  ;;  %v5807_v22 = vld [vmem:[#allocation6 + $0xb44] ss:$16 sps:$4 sm:$0xff]  }
 0x164   :  { %3706 = vmatpush1.bf16.msra.mxu1 %v5730_v26  ;;  %v5808_v26 = vld [vmem:[#allocation6 + $0x748] ss:$16 sps:$4 sm:$0xff]  }
 0x165   :  { %3448 = vmatpush1.bf16.msra.mxu0 %v5727_v25  ;;  %3707 = vmatprep.subr.bf16.mxu1 %v5738_v28  ;;  %v5805_v25 = vld [vmem:[#allocation6 + $0xb40] ss:$16 sps:$4 sm:$0xff]   ;;  %v5816_v28 = vld [vmem:[#allocation6 + $0x76c] ss:$16 sps:$4 sm:$0xff]  }
 0x166   :  { %3449 = vmatprep.subr.bf16.mxu0 %v5735_v27  ;;  %v5813_v27 = vld [vmem:[#allocation6 + $0xb64] ss:$16 sps:$4 sm:$0xff]  }
 0x168   :  { %3708 = vmatpush1.bf16.msra.mxu1 %v5736_v30  ;;  %v5814_v30 = vld [vmem:[#allocation6 + $0x768] ss:$16 sps:$4 sm:$0xff]  }
 0x169   :  { %3450 = vmatpush1.bf16.msra.mxu0 %v5733_v29  ;;  %3709 = vmatprep.subr.bf16.mxu1 %v5744_v32  ;;  %v5811_v29 = vld [vmem:[#allocation6 + $0xb60] ss:$16 sps:$4 sm:$0xff]   ;;  %v5822_v32 = vld [vmem:[#allocation6 + $0x78c] ss:$16 sps:$4 sm:$0xff]  }
 0x16a   :  { %3451 = vmatprep.subr.bf16.mxu0 %v5741_v31  ;;  %v5819_v31 = vld [vmem:[#allocation6 + $0xb84] ss:$16 sps:$4 sm:$0xff]  }
 0x16c   :  { %3710 = vmatpush1.bf16.msra.mxu1 %v5742_v12  ;;  %v5820_v12 = vld [vmem:[#allocation6 + $0x788] ss:$16 sps:$4 sm:$0xff]  }
 0x16d   :  { %3452 = vmatpush1.bf16.msra.mxu0 %v5739_v35  ;;  %3722 = vmatprep.subr.bf16.mxu1 %v5750_v40  ;;  %v5817_v35 = vld [vmem:[#allocation6 + $0xb80] ss:$16 sps:$4 sm:$0xff]   ;;  %v5826_v40 = vld [vmem:[#allocation6 + $0x7a8] ss:$16 sps:$4 sm:$0xff]  }
 0x16e   :  { %3464 = vmatprep.subr.bf16.mxu0 %v5747_v39  ;;  %v5823_v39 = vld [vmem:[#allocation6 + $0xba0] ss:$16 sps:$4 sm:$0xff]  }
 0x16f   :  { %3712 = vmatmul.mubr.bf16.vlgmr.msra.gmra.mrb[4].mxu1 %v6558_v24  ;;  %v5768_v24 = vld [vmem:[#allocation6 + $0x66c] ss:$16 sps:$4 sm:$0xff]  }
 0x170   :  { %3454 = vmatmul.mubr.bf16.vlgmr.msra.gmra.mrb[0].mxu0 %v6574_v42  ;;  %3723 = vmatpush1.bf16.msra.mxu1 %v5748_v45  ;;  %v5832_v45 = vld [vmem:[#allocation6 + $0x7c8] ss:$16 sps:$4 sm:$0xff]  }
 0x171   :  { %3465 = vmatpush1.bf16.msra.mxu0 %v5745_v41  ;;  %3724 = vmatprep.subr.bf16.mxu1 %v5756_v46  ;;  %v5831_v41 = vld [vmem:[#allocation6 + $0xbc4] ss:$16 sps:$4 sm:$0xff]   ;;  %v5840_v46 = vld [vmem:[#allocation6 + $0x7ec] ss:$16 sps:$4 sm:$0xff]  }
 0x172   :  { %3466 = vmatprep.subr.bf16.mxu0 %v5753_v15  ;;  %3496 = vmatprep.mubr.bf16.mxu0 %v6576_v47  ;;  %v5837_v15 = vld [vmem:[#allocation6 + $0xbe4] ss:$16 sps:$4 sm:$0xff]  }
 0x173   :  { %3754 = vmatprep.mubr.bf16.mxu1 %v6562_v33  ;;  %v5772_v33 = vld [vmem:[#allocation6 + $0x688] ss:$16 sps:$4 sm:$0xff]  }
 0x174   :  { %3725 = vmatpush1.bf16.msra.mxu1 %v5754_v49  ;;  %v5838_v49 = vld [vmem:[#allocation6 + $0x7e8] ss:$16 sps:$4 sm:$0xff]  }
 0x175   :  { %3467 = vmatpush1.bf16.msra.mxu0 %v5751_v48  ;;  %3726 = vmatprep.subr.bf16.mxu1 %v5762_v44  ;;  %v5835_v48 = vld [vmem:[#allocation6 + $0xbe0] ss:$16 sps:$4 sm:$0xff]  }
 0x176   :  { %3468 = vmatprep.subr.bf16.mxu0 %v5759_v50  ;;  %v117_v50 = vld [vmem:[#allocation3 + $0x50] sm:$0xff] }
 0x177   :  { %v133_v44 = vld [vmem:[#allocation3 + $0xd0] sm:$0xff] }
 0x178   :  { %3727 = vmatpush1.bf16.msra.mxu1 %v5760_v52  ;;  %v5846_v52 = vld [vmem:[#allocation6 + $0x80c] ss:$16 sps:$4 sm:$0xff]  }
 0x179   :  { %3469 = vmatpush1.bf16.msra.mxu0 %v5757_v51  ;;  %3728 = vmatprep.subr.bf16.mxu1 %v5768_v24  ;;  %v5843_v51 = vld [vmem:[#allocation6 + $0xc04] ss:$16 sps:$4 sm:$0xff]   ;;  %v6590_v24 = vpack.c.bf16 %v133_v44, %v117_v50  ;;  %v5924_v44 = vld [vmem:[#allocation6 + $0x9ac] ss:$16 sps:$4 sm:$0xff]  }
 0x17a   :  { %3470 = vmatprep.subr.bf16.mxu0 %v5765_v53  ;;  %v5841_v53 = vld [vmem:[#allocation6 + $0xc00] ss:$16 sps:$4 sm:$0xff]   ;;  %v5921_v50 = vld [vmem:[#allocation6 + $0xda4] ss:$16 sps:$4 sm:$0xff]  }
 0x17c   :  { %3729 = vmatpush1.bf16.msra.mxu1 %v5766_v56  ;;  %v136_v56 = vld [vmem:[#allocation3 + $0xe8] sm:$0xff] }
 0x17d   :  { %3471 = vmatpush1.bf16.msra.mxu0 %v5763_v54  ;;  %3730 = vmatprep.subr.bf16.mxu1 %v5774_v58  ;;  %v120_v54 = vld [vmem:[#allocation3 + $0x68] sm:$0xff]  ;;  %v5849_v58 = vld [vmem:[#allocation6 + $0xc24] ss:$16 sps:$4 sm:$0xff]  }
 0x17e   :  { %3472 = vmatprep.subr.bf16.mxu0 %v5771_v57  ;;  %v5844_v57 = vld [vmem:[#allocation6 + $0x808] ss:$16 sps:$4 sm:$0xff]  }
 0x180   :  { %3731 = vmatpush1.bf16.msra.mxu1 %v5772_v33  ;;  %v5847_v33 = vld [vmem:[#allocation6 + $0xc20] ss:$16 sps:$4 sm:$0xff]  }
 0x181   :  { %3473 = vmatpush1.bf16.msra.mxu0 %v5769_v59  ;;  %3732 = vmatprep.subr.bf16.mxu1 %v5780_v61  ;;  %v5852_v59 = vld [vmem:[#allocation6 + $0x82c] ss:$16 sps:$4 sm:$0xff]   ;;  %v6592_v61 = vpack.c.bf16 %v136_v56, %v120_v54  ;;  %v5925_v56 = vld [vmem:[#allocation6 + $0xdc0] ss:$16 sps:$4 sm:$0xff]  }
 0x182   :  { %3474 = vmatprep.subr.bf16.mxu0 %v5777_v60  ;;  %v6582_v2 = vpop.f32.mrb[0].mxu1  ;;  %v5850_v60 = vld [vmem:[#allocation6 + $0x828] ss:$16 sps:$4 sm:$0xff]   ;;  %v5930_v54 = vld [vmem:[#allocation6 + $0x9cc] ss:$16 sps:$4 sm:$0xff]  }
 0x183   :  { %v6584_v3 = vpop.f32.mrb[1].mxu1 }
 0x184   :  { %v6586_v5 = vpop.f32.mrb[2].mxu1  ;;  %3733 = vmatpush1.bf16.msra.mxu1 %v5778_v63  ;;  %v5858_v63 = vld [vmem:[#allocation6 + $0x84c] ss:$16 sps:$4 sm:$0xff]  }
 0x185   :  { %3475 = vmatpush1.bf16.msra.mxu0 %v5775_v62  ;;  %v6588_v7 = vpop.f32.mrb[3].mxu1  ;;  %3734 = vmatprep.subr.bf16.mxu1 %v5786_v1  ;;  %v5855_v62 = vld [vmem:[#allocation6 + $0xc44] ss:$16 sps:$4 sm:$0xff]   ;;  %v5856_v1 = vld [vmem:[#allocation6 + $0x848] ss:$16 sps:$4 sm:$0xff]  }
 0x186   :  { %3476 = vmatprep.subr.bf16.mxu0 %v5783_v0  ;;  %v5853_v0 = vld [vmem:[#allocation6 + $0xc40] ss:$16 sps:$4 sm:$0xff]  }
 0x188   :  { %3735 = vmatpush1.bf16.msra.mxu1 %v5784_v6  ;;  %v5864_v6 = vld [vmem:[#allocation6 + $0x86c] ss:$16 sps:$4 sm:$0xff]  }
 0x189   :  { %3477 = vmatpush1.bf16.msra.mxu0 %v5781_v4  ;;  %3736 = vmatprep.subr.bf16.mxu1 %v5792_v9  ;;  %v5861_v4 = vld [vmem:[#allocation6 + $0xc64] ss:$16 sps:$4 sm:$0xff]  }
 0x18a   :  { %3478 = vmatprep.subr.bf16.mxu0 %v5789_v8  ;;  %v5859_v8 = vld [vmem:[#allocation6 + $0xc60] ss:$16 sps:$4 sm:$0xff]   ;;  %v5867_v9 = vld [vmem:[#allocation6 + $0xc84] ss:$16 sps:$4 sm:$0xff]  }
 0x18c   :  { %3737 = vmatpush1.bf16.msra.mxu1 %v5790_v11  ;;  %v5865_v11 = vld [vmem:[#allocation6 + $0xc80] ss:$16 sps:$4 sm:$0xff]  }
 0x18d   :  { %3479 = vmatpush1.bf16.msra.mxu0 %v5787_v10  ;;  %3738 = vmatprep.subr.bf16.mxu1 %v5798_v14  ;;  %v5870_v10 = vld [vmem:[#allocation6 + $0x88c] ss:$16 sps:$4 sm:$0xff]   ;;  %v5873_v14 = vld [vmem:[#allocation6 + $0xca4] ss:$16 sps:$4 sm:$0xff]  }
 0x18e   :  { %3480 = vmatprep.subr.bf16.mxu0 %v5795_v13  ;;  %v5868_v13 = vld [vmem:[#allocation6 + $0x888] ss:$16 sps:$4 sm:$0xff]  }
 0x190   :  { %3739 = vmatpush1.bf16.msra.mxu1 %v5796_v17  ;;  %v5874_v17 = vld [vmem:[#allocation6 + $0x8a8] ss:$16 sps:$4 sm:$0xff]  }
 0x191   :  { %3481 = vmatpush1.bf16.msra.mxu0 %v5793_v16  ;;  %3740 = vmatprep.subr.bf16.mxu1 %v5804_v19  ;;  %v5871_v16 = vld [vmem:[#allocation6 + $0xca0] ss:$16 sps:$4 sm:$0xff]   ;;  %v5882_v19 = vld [vmem:[#allocation6 + $0x8cc] ss:$16 sps:$4 sm:$0xff]  }
 0x192   :  { %3482 = vmatprep.subr.bf16.mxu0 %v5801_v18  ;;  %v5879_v18 = vld [vmem:[#allocation6 + $0xcc4] ss:$16 sps:$4 sm:$0xff]  }
 0x194   :  { %3741 = vmatpush1.bf16.msra.mxu1 %v5802_v21  ;;  %v5880_v21 = vld [vmem:[#allocation6 + $0x8c8] ss:$16 sps:$4 sm:$0xff]  }
 0x195   :  { %3483 = vmatpush1.bf16.msra.mxu0 %v5799_v20  ;;  %3742 = vmatprep.subr.bf16.mxu1 %v5810_v23  ;;  %v5877_v20 = vld [vmem:[#allocation6 + $0xcc0] ss:$16 sps:$4 sm:$0xff]   ;;  %v5888_v23 = vld [vmem:[#allocation6 + $0x8ec] ss:$16 sps:$4 sm:$0xff]  }
 0x196   :  { %3484 = vmatprep.subr.bf16.mxu0 %v5807_v22  ;;  %v5885_v22 = vld [vmem:[#allocation6 + $0xce4] ss:$16 sps:$4 sm:$0xff]  }
 0x198   :  { %3743 = vmatpush1.bf16.msra.mxu1 %v5808_v26  ;;  %v5886_v26 = vld [vmem:[#allocation6 + $0x8e8] ss:$16 sps:$4 sm:$0xff]  }
 0x199   :  { %3485 = vmatpush1.bf16.msra.mxu0 %v5805_v25  ;;  %3744 = vmatprep.subr.bf16.mxu1 %v5816_v28  ;;  %v5883_v25 = vld [vmem:[#allocation6 + $0xce0] ss:$16 sps:$4 sm:$0xff]   ;;  %v5894_v28 = vld [vmem:[#allocation6 + $0x90c] ss:$16 sps:$4 sm:$0xff]  }
 0x19a   :  { %3486 = vmatprep.subr.bf16.mxu0 %v5813_v27  ;;  %v5891_v27 = vld [vmem:[#allocation6 + $0xd04] ss:$16 sps:$4 sm:$0xff]  }
 0x19c   :  { %3745 = vmatpush1.bf16.msra.mxu1 %v5814_v30  ;;  %v5892_v30 = vld [vmem:[#allocation6 + $0x908] ss:$16 sps:$4 sm:$0xff]  }
 0x19d   :  { %3487 = vmatpush1.bf16.msra.mxu0 %v5811_v29  ;;  %3746 = vmatprep.subr.bf16.mxu1 %v5822_v32  ;;  %v5889_v29 = vld [vmem:[#allocation6 + $0xd00] ss:$16 sps:$4 sm:$0xff]   ;;  %v5900_v32 = vld [vmem:[#allocation6 + $0x92c] ss:$16 sps:$4 sm:$0xff]  }
 0x19e   :  { %3488 = vmatprep.subr.bf16.mxu0 %v5819_v31  ;;  %v5897_v31 = vld [vmem:[#allocation6 + $0xd24] ss:$16 sps:$4 sm:$0xff]  }
 0x1a0   :  { %3747 = vmatpush1.bf16.msra.mxu1 %v5820_v12  ;;  %v5898_v12 = vld [vmem:[#allocation6 + $0x928] ss:$16 sps:$4 sm:$0xff]  }
 0x1a1   :  { %3489 = vmatpush1.bf16.msra.mxu0 %v5817_v35  ;;  %3748 = vmatprep.subr.bf16.mxu1 %v5828_v37  ;;  %v5895_v35 = vld [vmem:[#allocation6 + $0xd20] ss:$16 sps:$4 sm:$0xff]   ;;  %v5906_v37 = vld [vmem:[#allocation6 + $0x94c] ss:$16 sps:$4 sm:$0xff]  }
 0x1a2   :  { %3490 = vmatprep.subr.bf16.mxu0 %v5825_v36  ;;  %v5903_v36 = vld [vmem:[#allocation6 + $0xd44] ss:$16 sps:$4 sm:$0xff]  }
 0x1a4   :  { %3749 = vmatpush1.bf16.msra.mxu1 %v5826_v40  ;;  %v5904_v40 = vld [vmem:[#allocation6 + $0x948] ss:$16 sps:$4 sm:$0xff]  }
 0x1a5   :  { %3491 = vmatpush1.bf16.msra.mxu0 %v5823_v39  ;;  %3750 = vmatprep.subr.bf16.mxu1 %v5834_v55  ;;  %v5901_v39 = vld [vmem:[#allocation6 + $0xd40] ss:$16 sps:$4 sm:$0xff]   ;;  %v5912_v55 = vld [vmem:[#allocation6 + $0x96c] ss:$16 sps:$4 sm:$0xff]  }
 0x1a6   :  { %3492 = vmatprep.subr.bf16.mxu0 %v5831_v41  ;;  %v5909_v41 = vld [vmem:[#allocation6 + $0xd64] ss:$16 sps:$4 sm:$0xff]  }
 0x1a8   :  { %3751 = vmatpush1.bf16.msra.mxu1 %v5832_v45  ;;  %v5910_v45 = vld [vmem:[#allocation6 + $0x968] ss:$16 sps:$4 sm:$0xff]  }
 0x1a9   :  { %3493 = vmatpush1.bf16.msra.mxu0 %v5829_v43  ;;  %3752 = vmatprep.subr.bf16.mxu1 %v5840_v46  ;;  %v5907_v43 = vld [vmem:[#allocation6 + $0xd60] ss:$16 sps:$4 sm:$0xff]   ;;  %v5918_v46 = vld [vmem:[#allocation6 + $0x98c] ss:$16 sps:$4 sm:$0xff]  }
 0x1aa   :  { %3494 = vmatprep.subr.bf16.mxu0 %v5837_v15  ;;  %v5915_v15 = vld [vmem:[#allocation6 + $0xd84] ss:$16 sps:$4 sm:$0xff]  }
 0x1ac   :  { %3753 = vmatpush1.bf16.msra.mxu1 %v5838_v49  ;;  %v5916_v49 = vld [vmem:[#allocation6 + $0x988] ss:$16 sps:$4 sm:$0xff]  }
 0x1ad   :  { %3495 = vmatpush1.bf16.msra.mxu0 %v5835_v48  ;;  %3765 = vmatprep.subr.bf16.mxu1 %v5846_v52  ;;  %v5913_v48 = vld [vmem:[#allocation6 + $0xd80] ss:$16 sps:$4 sm:$0xff]   ;;  %v5922_v52 = vld [vmem:[#allocation6 + $0x9a8] ss:$16 sps:$4 sm:$0xff]  }
 0x1ae   :  { %3507 = vmatprep.subr.bf16.mxu0 %v5843_v51  ;;  %v5919_v51 = vld [vmem:[#allocation6 + $0xda0] ss:$16 sps:$4 sm:$0xff]  }
 0x1af   :  { %3755 = vmatmul.mubr.bf16.vlgmr.msra.gmra.mrb[4].mxu1 %v6566_v34  ;;  %v5862_v34 = vld [vmem:[#allocation6 + $0x868] ss:$16 sps:$4 sm:$0xff]  }
 0x1b0   :  { %3497 = vmatmul.mubr.bf16.vlgmr.msra.gmra.mrb[0].mxu0 %v6590_v24  ;;  %3766 = vmatpush1.bf16.msra.mxu1 %v5844_v57  ;;  %v5928_v57 = vld [vmem:[#allocation6 + $0x9c8] ss:$16 sps:$4 sm:$0xff]  }
 0x1b1   :  { %3508 = vmatpush1.bf16.msra.mxu0 %v5841_v53  ;;  %3767 = vmatprep.subr.bf16.mxu1 %v5852_v59  ;;  %v5927_v53 = vld [vmem:[#allocation6 + $0xdc4] ss:$16 sps:$4 sm:$0xff]   ;;  %v5936_v59 = vld [vmem:[#allocation6 + $0x9ec] ss:$16 sps:$4 sm:$0xff]  }
 0x1b2   :  { %3509 = vmatprep.subr.bf16.mxu0 %v5849_v58  ;;  %3539 = vmatprep.mubr.bf16.mxu0 %v6592_v61  ;;  %v5933_v58 = vld [vmem:[#allocation6 + $0xde4] ss:$16 sps:$4 sm:$0xff]  }
 0x1b3   :  { %3797 = vmatprep.mubr.bf16.mxu1 %v6568_v38  ;;  %v5876_v38 = vld [vmem:[#allocation6 + $0x8ac] ss:$16 sps:$4 sm:$0xff]  }
 0x1b4   :  { %3768 = vmatpush1.bf16.msra.mxu1 %v5850_v60  ;;  %v5934_v60 = vld [vmem:[#allocation6 + $0x9e8] ss:$16 sps:$4 sm:$0xff]  }
 0x1b5   :  { %3510 = vmatpush1.bf16.msra.mxu0 %v5847_v33  ;;  %3769 = vmatprep.subr.bf16.mxu1 %v5858_v63  ;;  %v5931_v33 = vld [vmem:[#allocation6 + $0xde0] ss:$16 sps:$4 sm:$0xff]  }
 0x1b6   :  { %3511 = vmatprep.subr.bf16.mxu0 %v5855_v62  ;;  %v119_v62 = vld [vmem:[#allocation3 + $0x60] sm:$0xff] }
 0x1b7   :  { %v135_v63 = vld [vmem:[#allocation3 + $0xe0] sm:$0xff] }
 0x1b8   :  { %3770 = vmatpush1.bf16.msra.mxu1 %v5856_v1  ;;  %v5942_v1 = vld [vmem:[#allocation6 + $0xa0c] ss:$16 sps:$4 sm:$0xff]  }
 0x1b9   :  { %3512 = vmatpush1.bf16.msra.mxu0 %v5853_v0  ;;  %3771 = vmatprep.subr.bf16.mxu1 %v5864_v6  ;;  %v5939_v0 = vld [vmem:[#allocation6 + $0xe04] ss:$16 sps:$4 sm:$0xff]   ;;  %v122_v6 = vld [vmem:[#allocation3 + $0x78] sm:$0xff] }
 0x1ba   :  { %3513 = vmatprep.subr.bf16.mxu0 %v5861_v4  ;;  %v6598_v4 = vpack.c.bf16 %v135_v63, %v119_v62  ;;  %v6017_v62 = vld [vmem:[#allocation6 + $0xfa4] ss:$16 sps:$4 sm:$0xff]   ;;  %v6020_v63 = vld [vmem:[#allocation6 + $0xbac] ss:$16 sps:$4 sm:$0xff]  }
 0x1bc   :  { %3772 = vmatpush1.bf16.msra.mxu1 %v5862_v34  ;;  %v5937_v34 = vld [vmem:[#allocation6 + $0xe00] ss:$16 sps:$4 sm:$0xff]  }
 0x1bd   :  { %3514 = vmatpush1.bf16.msra.mxu0 %v5859_v8  ;;  %3773 = vmatprep.subr.bf16.mxu1 %v5870_v10  ;;  %v138_v8 = vld [vmem:[#allocation3 + $0xf8] sm:$0xff]  ;;  %v5945_v10 = vld [vmem:[#allocation6 + $0xe24] ss:$16 sps:$4 sm:$0xff]  }
 0x1be   :  { %3515 = vmatprep.subr.bf16.mxu0 %v5867_v9  ;;  %v5940_v9 = vld [vmem:[#allocation6 + $0xa08] ss:$16 sps:$4 sm:$0xff]  }
 0x1c0   :  { %3774 = vmatpush1.bf16.msra.mxu1 %v5868_v13  ;;  %v6600_v13 = vpack.c.bf16 %v138_v8, %v122_v6  ;;  %v6023_v6 = vld [vmem:[#allocation6 + $0xfc4] ss:$16 sps:$4 sm:$0xff]   ;;  %v6026_v8 = vld [vmem:[#allocation6 + $0xbcc] ss:$16 sps:$4 sm:$0xff]  }
 0x1c1   :  { %3516 = vmatpush1.bf16.msra.mxu0 %v5865_v11  ;;  %3775 = vmatprep.subr.bf16.mxu1 %v5876_v38  ;;  %v5948_v11 = vld [vmem:[#allocation6 + $0xa2c] ss:$16 sps:$4 sm:$0xff]   ;;  %v5946_v38 = vld [vmem:[#allocation6 + $0xa28] ss:$16 sps:$4 sm:$0xff]  }
 0x1c2   :  { %3517 = vmatprep.subr.bf16.mxu0 %v5873_v14  ;;  %v5943_v14 = vld [vmem:[#allocation6 + $0xe20] ss:$16 sps:$4 sm:$0xff]  }
 0x1c4   :  { %3776 = vmatpush1.bf16.msra.mxu1 %v5874_v17  ;;  %v5954_v17 = vld [vmem:[#allocation6 + $0xa4c] ss:$16 sps:$4 sm:$0xff]  }
 0x1c5   :  { %3518 = vmatpush1.bf16.msra.mxu0 %v5871_v16  ;;  %3777 = vmatprep.subr.bf16.mxu1 %v5882_v19  ;;  %v5951_v16 = vld [vmem:[#allocation6 + $0xe44] ss:$16 sps:$4 sm:$0xff]   ;;  %v5952_v19 = vld [vmem:[#allocation6 + $0xa48] ss:$16 sps:$4 sm:$0xff]  }
 0x1c6   :  { %3519 = vmatprep.subr.bf16.mxu0 %v5879_v18  ;;  %v5949_v18 = vld [vmem:[#allocation6 + $0xe40] ss:$16 sps:$4 sm:$0xff]  }
 0x1c8   :  { %3778 = vmatpush1.bf16.msra.mxu1 %v5880_v21  ;;  %v5955_v21 = vld [vmem:[#allocation6 + $0xe60] ss:$16 sps:$4 sm:$0xff]  }
 0x1c9   :  { %3520 = vmatpush1.bf16.msra.mxu0 %v5877_v20  ;;  %3779 = vmatprep.subr.bf16.mxu1 %v5888_v23  ;;  %v5957_v20 = vld [vmem:[#allocation6 + $0xe64] ss:$16 sps:$4 sm:$0xff]  }
 0x1ca   :  { %3521 = vmatprep.subr.bf16.mxu0 %v5885_v22  ;;  %v5958_v22 = vld [vmem:[#allocation6 + $0xa68] ss:$16 sps:$4 sm:$0xff]   ;;  %v5963_v23 = vld [vmem:[#allocation6 + $0xe84] ss:$16 sps:$4 sm:$0xff]  }
 0x1cc   :  { %3780 = vmatpush1.bf16.msra.mxu1 %v5886_v26  ;;  %v5961_v26 = vld [vmem:[#allocation6 + $0xe80] ss:$16 sps:$4 sm:$0xff]  }
 0x1cd   :  { %3522 = vmatpush1.bf16.msra.mxu0 %v5883_v25  ;;  %3781 = vmatprep.subr.bf16.mxu1 %v5894_v28  ;;  %v5966_v25 = vld [vmem:[#allocation6 + $0xa8c] ss:$16 sps:$4 sm:$0xff]  }
 0x1ce   :  { %3523 = vmatprep.subr.bf16.mxu0 %v5891_v27  ;;  %v5969_v27 = vld [vmem:[#allocation6 + $0xea4] ss:$16 sps:$4 sm:$0xff]   ;;  %v5972_v28 = vld [vmem:[#allocation6 + $0xaac] ss:$16 sps:$4 sm:$0xff]  }
 0x1d0   :  { %3782 = vmatpush1.bf16.msra.mxu1 %v5892_v30  ;;  %v5970_v30 = vld [vmem:[#allocation6 + $0xaa8] ss:$16 sps:$4 sm:$0xff]  }
 0x1d1   :  { %3524 = vmatpush1.bf16.msra.mxu0 %v5889_v29  ;;  %3783 = vmatprep.subr.bf16.mxu1 %v5900_v32  ;;  %v5967_v29 = vld [vmem:[#allocation6 + $0xea0] ss:$16 sps:$4 sm:$0xff]   ;;  %v5978_v32 = vld [vmem:[#allocation6 + $0xacc] ss:$16 sps:$4 sm:$0xff]  }
 0x1d2   :  { %3525 = vmatprep.subr.bf16.mxu0 %v5897_v31  ;;  %v5975_v31 = vld [vmem:[#allocation6 + $0xec4] ss:$16 sps:$4 sm:$0xff]  }
 0x1d4   :  { %3784 = vmatpush1.bf16.msra.mxu1 %v5898_v12  ;;  %v5976_v12 = vld [vmem:[#allocation6 + $0xac8] ss:$16 sps:$4 sm:$0xff]  }
 0x1d5   :  { %3526 = vmatpush1.bf16.msra.mxu0 %v5895_v35  ;;  %3785 = vmatprep.subr.bf16.mxu1 %v5906_v37  ;;  %v5973_v35 = vld [vmem:[#allocation6 + $0xec0] ss:$16 sps:$4 sm:$0xff]   ;;  %v5984_v37 = vld [vmem:[#allocation6 + $0xaec] ss:$16 sps:$4 sm:$0xff]  }
 0x1d6   :  { %3527 = vmatprep.subr.bf16.mxu0 %v5903_v36  ;;  %v5981_v36 = vld [vmem:[#allocation6 + $0xee4] ss:$16 sps:$4 sm:$0xff]  }
 0x1d8   :  { %3786 = vmatpush1.bf16.msra.mxu1 %v5904_v40  ;;  %v5982_v40 = vld [vmem:[#allocation6 + $0xae8] ss:$16 sps:$4 sm:$0xff]  }
 0x1d9   :  { %3528 = vmatpush1.bf16.msra.mxu0 %v5901_v39  ;;  %3787 = vmatprep.subr.bf16.mxu1 %v5912_v55  ;;  %v5979_v39 = vld [vmem:[#allocation6 + $0xee0] ss:$16 sps:$4 sm:$0xff]   ;;  %v5990_v55 = vld [vmem:[#allocation6 + $0xb0c] ss:$16 sps:$4 sm:$0xff]  }
 0x1da   :  { %3529 = vmatprep.subr.bf16.mxu0 %v5909_v41  ;;  %v5987_v41 = vld [vmem:[#allocation6 + $0xf04] ss:$16 sps:$4 sm:$0xff]  }
 0x1dc   :  { %3788 = vmatpush1.bf16.msra.mxu1 %v5910_v45  ;;  %v5988_v45 = vld [vmem:[#allocation6 + $0xb08] ss:$16 sps:$4 sm:$0xff]  }
 0x1dd   :  { %3530 = vmatpush1.bf16.msra.mxu0 %v5907_v43  ;;  %3789 = vmatprep.subr.bf16.mxu1 %v5918_v46  ;;  %v5985_v43 = vld [vmem:[#allocation6 + $0xf00] ss:$16 sps:$4 sm:$0xff]   ;;  %v5996_v46 = vld [vmem:[#allocation6 + $0xb2c] ss:$16 sps:$4 sm:$0xff]  }
 0x1de   :  { %3531 = vmatprep.subr.bf16.mxu0 %v5915_v15  ;;  %v5993_v15 = vld [vmem:[#allocation6 + $0xf24] ss:$16 sps:$4 sm:$0xff]  }
 0x1e0   :  { %3790 = vmatpush1.bf16.msra.mxu1 %v5916_v49  ;;  %v5994_v49 = vld [vmem:[#allocation6 + $0xb28] ss:$16 sps:$4 sm:$0xff]  }
 0x1e1   :  { %3532 = vmatpush1.bf16.msra.mxu0 %v5913_v48  ;;  %3791 = vmatprep.subr.bf16.mxu1 %v5924_v44  ;;  %v5991_v48 = vld [vmem:[#allocation6 + $0xf20] ss:$16 sps:$4 sm:$0xff]   ;;  %v6002_v44 = vld [vmem:[#allocation6 + $0xb4c] ss:$16 sps:$4 sm:$0xff]  }
 0x1e2   :  { %3533 = vmatprep.subr.bf16.mxu0 %v5921_v50  ;;  %v5999_v50 = vld [vmem:[#allocation6 + $0xf44] ss:$16 sps:$4 sm:$0xff]  }
 0x1e4   :  { %3792 = vmatpush1.bf16.msra.mxu1 %v5922_v52  ;;  %v6000_v52 = vld [vmem:[#allocation6 + $0xb48] ss:$16 sps:$4 sm:$0xff]  }
 0x1e5   :  { %3534 = vmatpush1.bf16.msra.mxu0 %v5919_v51  ;;  %3793 = vmatprep.subr.bf16.mxu1 %v5930_v54  ;;  %v5997_v51 = vld [vmem:[#allocation6 + $0xf40] ss:$16 sps:$4 sm:$0xff]   ;;  %v6008_v54 = vld [vmem:[#allocation6 + $0xb6c] ss:$16 sps:$4 sm:$0xff]  }
 0x1e6   :  { %3535 = vmatprep.subr.bf16.mxu0 %v5927_v53  ;;  %v6005_v53 = vld [vmem:[#allocation6 + $0xf64] ss:$16 sps:$4 sm:$0xff]  }
 0x1e8   :  { %3794 = vmatpush1.bf16.msra.mxu1 %v5928_v57  ;;  %v6006_v57 = vld [vmem:[#allocation6 + $0xb68] ss:$16 sps:$4 sm:$0xff]  }
 0x1e9   :  { %3536 = vmatpush1.bf16.msra.mxu0 %v5925_v56  ;;  %3795 = vmatprep.subr.bf16.mxu1 %v5936_v59  ;;  %v6003_v56 = vld [vmem:[#allocation6 + $0xf60] ss:$16 sps:$4 sm:$0xff]   ;;  %v6014_v59 = vld [vmem:[#allocation6 + $0xb8c] ss:$16 sps:$4 sm:$0xff]  }
 0x1ea   :  { %3537 = vmatprep.subr.bf16.mxu0 %v5933_v58  ;;  %v6011_v58 = vld [vmem:[#allocation6 + $0xf84] ss:$16 sps:$4 sm:$0xff]  }
 0x1ec   :  { %3796 = vmatpush1.bf16.msra.mxu1 %v5934_v60  ;;  %v6012_v60 = vld [vmem:[#allocation6 + $0xb88] ss:$16 sps:$4 sm:$0xff]  }
 0x1ed   :  { %3538 = vmatpush1.bf16.msra.mxu0 %v5931_v33  ;;  %3808 = vmatprep.subr.bf16.mxu1 %v5942_v1  ;;  %v6009_v33 = vld [vmem:[#allocation6 + $0xf80] ss:$16 sps:$4 sm:$0xff]   ;;  %v6018_v1 = vld [vmem:[#allocation6 + $0xba8] ss:$16 sps:$4 sm:$0xff]  }
 0x1ee   :  { %3550 = vmatprep.subr.bf16.mxu0 %v5939_v0  ;;  %v6015_v0 = vld [vmem:[#allocation6 + $0xfa0] ss:$16 sps:$4 sm:$0xff]  }
 0x1ef   :  { %3798 = vmatmul.mubr.bf16.vlgmr.msra.gmra.mrb[4].mxu1 %v6574_v42  ;;  %v5960_v42 = vld [vmem:[#allocation6 + $0xa6c] ss:$16 sps:$4 sm:$0xff]  }
 0x1f0   :  { %3540 = vmatmul.mubr.bf16.vlgmr.msra.gmra.mrb[0].mxu0 %v6598_v4  ;;  %3809 = vmatpush1.bf16.msra.mxu1 %v5940_v9  ;;  %v6024_v9 = vld [vmem:[#allocation6 + $0xbc8] ss:$16 sps:$4 sm:$0xff]  }
 0x1f1   :  { %3551 = vmatpush1.bf16.msra.mxu0 %v5937_v34  ;;  %3810 = vmatprep.subr.bf16.mxu1 %v5948_v11  ;;  %v6021_v34 = vld [vmem:[#allocation6 + $0xfc0] ss:$16 sps:$4 sm:$0xff]   ;;  %v6032_v11 = vld [vmem:[#allocation6 + $0xbec] ss:$16 sps:$4 sm:$0xff]  }
 0x1f2   :  { %3552 = vmatprep.subr.bf16.mxu0 %v5945_v10  ;;  %3582 = vmatprep.mubr.bf16.mxu0 %v6600_v13  ;;  %v6029_v10 = vld [vmem:[#allocation6 + $0xfe4] ss:$16 sps:$4 sm:$0xff]  }
 0x1f3   :  { %3840 = vmatprep.mubr.bf16.mxu1 %v6576_v47  ;;  %v5964_v47 = vld [vmem:[#allocation6 + $0xa88] ss:$16 sps:$4 sm:$0xff]  }
 0x1f4   :  { %3811 = vmatpush1.bf16.msra.mxu1 %v5946_v38  ;;  %v6030_v38 = vld [vmem:[#allocation6 + $0xbe8] ss:$16 sps:$4 sm:$0xff]  }
 0x1f5   :  { %3553 = vmatpush1.bf16.msra.mxu0 %v5943_v14  ;;  %3812 = vmatprep.subr.bf16.mxu1 %v5954_v17  ;;  %v6027_v14 = vld [vmem:[#allocation6 + $0xfe0] ss:$16 sps:$4 sm:$0xff]  }
 0x1f6   :  { %3554 = vmatprep.subr.bf16.mxu0 %v5951_v16  ;;  %v121_v16 = vld [vmem:[#allocation3 + $0x70] sm:$0xff] }
 0x1f7   :  { %v137_v17 = vld [vmem:[#allocation3 + $0xf0] sm:$0xff] }
 0x1f8   :  { %3813 = vmatpush1.bf16.msra.mxu1 %v5952_v19  ;;  %v6606_v19 = vpack.c.bf16 %v137_v17, %v121_v16  ;;  %v6077_v16 = vld [vmem:[#allocation6 + $0xdcc] ss:$16 sps:$4 sm:$0xff]  }
 0x1f9   :  { %3555 = vmatpush1.bf16.msra.mxu0 %v5949_v18  ;;  %3814 = vmatprep.subr.bf16.mxu1 %v5960_v42  ;;  %v6035_v18 = vld [vmem:[#allocation6 + $0xc0c] ss:$16 sps:$4 sm:$0xff]  }
 0x1fa   :  { %3556 = vmatprep.subr.bf16.mxu0 %v5957_v20  ;;  %v6033_v20 = vld [vmem:[#allocation6 + $0xc08] ss:$16 sps:$4 sm:$0xff]   ;;  %v6038_v42 = vld [vmem:[#allocation6 + $0xc2c] ss:$16 sps:$4 sm:$0xff]  }
 0x1fb   :  { %v6168_v17 = vld [vmem:[#allocation9 + $0xd0] ss:$8 sps:$4 sm:$0xff]  }
 0x1fc   :  { %3815 = vmatpush1.bf16.msra.mxu1 %v5958_v22  ;;  %v6131_v22 = vld [vmem:[#allocation9 + $0x4] ss:$8 sps:$4 sm:$0xff]  }
 0x1fd   :  { %3557 = vmatpush1.bf16.msra.mxu0 %v5955_v21  ;;  %3816 = vmatprep.subr.bf16.mxu1 %v5966_v25  ;;  %v6129_v21 = vld [vmem:[#allocation9] ss:$8 sps:$4 sm:$0xff]   ;;  %v6134_v25 = vld [vmem:[#allocation9 + $0x14] ss:$8 sps:$4 sm:$0xff]  }
 0x1fe   :  { %3558 = vmatprep.subr.bf16.mxu0 %v5963_v23  ;;  %v6036_v23 = vld [vmem:[#allocation6 + $0xc28] ss:$16 sps:$4 sm:$0xff]  }
 0x200   :  { %3817 = vmatpush1.bf16.msra.mxu1 %v5964_v47  ;;  %v6132_v47 = vld [vmem:[#allocation9 + $0x10] ss:$8 sps:$4 sm:$0xff]  }
 0x201   :  { %3559 = vmatpush1.bf16.msra.mxu0 %v5961_v26  ;;  %3818 = vmatprep.subr.bf16.mxu1 %v5972_v28  ;;  %v6041_v26 = vld [vmem:[#allocation6 + $0xc4c] ss:$16 sps:$4 sm:$0xff]   ;;  %v6039_v28 = vld [vmem:[#allocation6 + $0xc48] ss:$16 sps:$4 sm:$0xff]  }
 0x202   :  { %3560 = vmatprep.subr.bf16.mxu0 %v5969_v27  ;;  %v6137_v27 = vld [vmem:[#allocation9 + $0x24] ss:$8 sps:$4 sm:$0xff]  }
 0x204   :  { %3819 = vmatpush1.bf16.msra.mxu1 %v5970_v30  ;;  %v6140_v30 = vld [vmem:[#allocation9 + $0x34] ss:$8 sps:$4 sm:$0xff]  }
 0x205   :  { %3561 = vmatpush1.bf16.msra.mxu0 %v5967_v29  ;;  %3820 = vmatprep.subr.bf16.mxu1 %v5978_v32  ;;  %v6044_v29 = vld [vmem:[#allocation6 + $0xc6c] ss:$16 sps:$4 sm:$0xff]  }
 0x206   :  { %3562 = vmatprep.subr.bf16.mxu0 %v5975_v31  ;;  %v6042_v31 = vld [vmem:[#allocation6 + $0xc68] ss:$16 sps:$4 sm:$0xff]   ;;  %v6138_v32 = vld [vmem:[#allocation9 + $0x30] ss:$8 sps:$4 sm:$0xff]  }
 0x208   :  { %3821 = vmatpush1.bf16.msra.mxu1 %v5976_v12  ;;  %v6045_v12 = vld [vmem:[#allocation6 + $0xc88] ss:$16 sps:$4 sm:$0xff]  }
 0x209   :  { %3563 = vmatpush1.bf16.msra.mxu0 %v5973_v35  ;;  %3822 = vmatprep.subr.bf16.mxu1 %v5984_v37  ;;  %v6143_v35 = vld [vmem:[#allocation9 + $0x44] ss:$8 sps:$4 sm:$0xff]   ;;  %v6141_v37 = vld [vmem:[#allocation9 + $0x40] ss:$8 sps:$4 sm:$0xff]  }
 0x20a   :  { %3564 = vmatprep.subr.bf16.mxu0 %v5981_v36  ;;  %v6050_v36 = vld [vmem:[#allocation6 + $0xcac] ss:$16 sps:$4 sm:$0xff]  }
 0x20c   :  { %3823 = vmatpush1.bf16.msra.mxu1 %v5982_v40  ;;  %v6048_v40 = vld [vmem:[#allocation6 + $0xca8] ss:$16 sps:$4 sm:$0xff]  }
 0x20d   :  { %3565 = vmatpush1.bf16.msra.mxu0 %v5979_v39  ;;  %3824 = vmatprep.subr.bf16.mxu1 %v5990_v55  ;;  %v6146_v39 = vld [vmem:[#allocation9 + $0x54] ss:$8 sps:$4 sm:$0xff]   ;;  %v6144_v55 = vld [vmem:[#allocation9 + $0x50] ss:$8 sps:$4 sm:$0xff]  }
 0x20e   :  { %3566 = vmatprep.subr.bf16.mxu0 %v5987_v41  ;;  %v6053_v41 = vld [vmem:[#allocation6 + $0xccc] ss:$16 sps:$4 sm:$0xff]  }
 0x210   :  { %3825 = vmatpush1.bf16.msra.mxu1 %v5988_v45  ;;  %v6051_v45 = vld [vmem:[#allocation6 + $0xcc8] ss:$16 sps:$4 sm:$0xff]  }
 0x211   :  { %3567 = vmatpush1.bf16.msra.mxu0 %v5985_v43  ;;  %3826 = vmatprep.subr.bf16.mxu1 %v5996_v46  ;;  %v6149_v43 = vld [vmem:[#allocation9 + $0x64] ss:$8 sps:$4 sm:$0xff]   ;;  %v6147_v46 = vld [vmem:[#allocation9 + $0x60] ss:$8 sps:$4 sm:$0xff]  }
 0x212   :  { %3568 = vmatprep.subr.bf16.mxu0 %v5993_v15  ;;  %v6056_v15 = vld [vmem:[#allocation6 + $0xcec] ss:$16 sps:$4 sm:$0xff]  }
 0x214   :  { %3827 = vmatpush1.bf16.msra.mxu1 %v5994_v49  ;;  %v6054_v49 = vld [vmem:[#allocation6 + $0xce8] ss:$16 sps:$4 sm:$0xff]  }
 0x215   :  { %3569 = vmatpush1.bf16.msra.mxu0 %v5991_v48  ;;  %3828 = vmatprep.subr.bf16.mxu1 %v6002_v44  ;;  %v6152_v48 = vld [vmem:[#allocation9 + $0x74] ss:$8 sps:$4 sm:$0xff]   ;;  %v6150_v44 = vld [vmem:[#allocation9 + $0x70] ss:$8 sps:$4 sm:$0xff]  }
 0x216   :  { %3570 = vmatprep.subr.bf16.mxu0 %v5999_v50  ;;  %v6059_v50 = vld [vmem:[#allocation6 + $0xd0c] ss:$16 sps:$4 sm:$0xff]  }
 0x218   :  { %3829 = vmatpush1.bf16.msra.mxu1 %v6000_v52  ;;  %v6057_v52 = vld [vmem:[#allocation6 + $0xd08] ss:$16 sps:$4 sm:$0xff]  }
 0x219   :  { %3571 = vmatpush1.bf16.msra.mxu0 %v5997_v51  ;;  %3830 = vmatprep.subr.bf16.mxu1 %v6008_v54  ;;  %v6155_v51 = vld [vmem:[#allocation9 + $0x84] ss:$8 sps:$4 sm:$0xff]   ;;  %v6153_v54 = vld [vmem:[#allocation9 + $0x80] ss:$8 sps:$4 sm:$0xff]  }
 0x21a   :  { %3572 = vmatprep.subr.bf16.mxu0 %v6005_v53  ;;  %v6062_v53 = vld [vmem:[#allocation6 + $0xd2c] ss:$16 sps:$4 sm:$0xff]  }
 0x21c   :  { %3831 = vmatpush1.bf16.msra.mxu1 %v6006_v57  ;;  %v6060_v57 = vld [vmem:[#allocation6 + $0xd28] ss:$16 sps:$4 sm:$0xff]  }
 0x21d   :  { %3573 = vmatpush1.bf16.msra.mxu0 %v6003_v56  ;;  %3832 = vmatprep.subr.bf16.mxu1 %v6014_v59  ;;  %v6158_v56 = vld [vmem:[#allocation9 + $0x94] ss:$8 sps:$4 sm:$0xff]   ;;  %v6156_v59 = vld [vmem:[#allocation9 + $0x90] ss:$8 sps:$4 sm:$0xff]  }
 0x21e   :  { %3574 = vmatprep.subr.bf16.mxu0 %v6011_v58  ;;  %v6065_v58 = vld [vmem:[#allocation6 + $0xd4c] ss:$16 sps:$4 sm:$0xff]  }
 0x220   :  { %3833 = vmatpush1.bf16.msra.mxu1 %v6012_v60  ;;  %v6063_v60 = vld [vmem:[#allocation6 + $0xd48] ss:$16 sps:$4 sm:$0xff]  }
 0x221   :  { %3575 = vmatpush1.bf16.msra.mxu0 %v6009_v33  ;;  %3834 = vmatprep.subr.bf16.mxu1 %v6020_v63  ;;  %v6161_v33 = vld [vmem:[#allocation9 + $0xa4] ss:$8 sps:$4 sm:$0xff]   ;;  %v6159_v63 = vld [vmem:[#allocation9 + $0xa0] ss:$8 sps:$4 sm:$0xff]  }
 0x222   :  { %3576 = vmatprep.subr.bf16.mxu0 %v6017_v62  ;;  %v6068_v62 = vld [vmem:[#allocation6 + $0xd6c] ss:$16 sps:$4 sm:$0xff]  }
 0x224   :  { %3835 = vmatpush1.bf16.msra.mxu1 %v6018_v1  ;;  %v6066_v1 = vld [vmem:[#allocation6 + $0xd68] ss:$16 sps:$4 sm:$0xff]  }
 0x225   :  { %3577 = vmatpush1.bf16.msra.mxu0 %v6015_v0  ;;  %3836 = vmatprep.subr.bf16.mxu1 %v6026_v8  ;;  %v6164_v0 = vld [vmem:[#allocation9 + $0xb4] ss:$8 sps:$4 sm:$0xff]   ;;  %v6162_v8 = vld [vmem:[#allocation9 + $0xb0] ss:$8 sps:$4 sm:$0xff]  }
 0x226   :  { %3578 = vmatprep.subr.bf16.mxu0 %v6023_v6  ;;  %v6071_v6 = vld [vmem:[#allocation6 + $0xd8c] ss:$16 sps:$4 sm:$0xff]  }
 0x228   :  { %3837 = vmatpush1.bf16.msra.mxu1 %v6024_v9  ;;  %v6069_v9 = vld [vmem:[#allocation6 + $0xd88] ss:$16 sps:$4 sm:$0xff]  }
 0x229   :  { %3579 = vmatpush1.bf16.msra.mxu0 %v6021_v34  ;;  %3838 = vmatprep.subr.bf16.mxu1 %v6032_v11  ;;  %v6167_v34 = vld [vmem:[#allocation9 + $0xc4] ss:$8 sps:$4 sm:$0xff]   ;;  %v6165_v11 = vld [vmem:[#allocation9 + $0xc0] ss:$8 sps:$4 sm:$0xff]  }
 0x22a   :  { %3580 = vmatprep.subr.bf16.mxu0 %v6029_v10  ;;  %v6074_v10 = vld [vmem:[#allocation6 + $0xdac] ss:$16 sps:$4 sm:$0xff]  }
 0x22c   :  { %3839 = vmatpush1.bf16.msra.mxu1 %v6030_v38  ;;  %v6072_v38 = vld [vmem:[#allocation6 + $0xda8] ss:$16 sps:$4 sm:$0xff]  }
 0x22d   :  { %3581 = vmatpush1.bf16.msra.mxu0 %v6027_v14  ;;  %3851 = vmatprep.subr.bf16.mxu1 %v6035_v18  ;;  %v6170_v14 = vld [vmem:[#allocation9 + $0xd4] ss:$8 sps:$4 sm:$0xff]  }
 0x22e   :  { %4345 = vmatprep.subr.bf16.mxu0 %v6131_v22  ;;  %v6075_v18 = vld [vmem:[#allocation6 + $0xdc8] ss:$16 sps:$4 sm:$0xff]  }
 0x22f   :  { %3841 = vmatmul.mubr.bf16.vlgmr.msra.gmra.mrb[4].mxu1 %v6590_v24  ;;  %v6135_v24 = vld [vmem:[#allocation9 + $0x20] ss:$8 sps:$4 sm:$0xff]   ;;  %v6081_v22 = vld [vmem:[#allocation6 + $0xe08] ss:$16 sps:$4 sm:$0xff]  }
 0x230   :  { %3583 = vmatmul.mubr.bf16.vlgmr.msra.gmra.mrb[0].mxu0 %v6606_v19  ;;  %3852 = vmatpush1.bf16.msra.mxu1 %v6033_v20  ;;  %v6080_v20 = vld [vmem:[#allocation6 + $0xdec] ss:$16 sps:$4 sm:$0xff]  }
 0x231   :  { %3883 = vmatprep.mubr.bf16.mxu1 %v6592_v61  ;;  %3853 = vmatprep.subr.bf16.mxu1 %v6038_v42  ;;  %v6047_v61 = vld [vmem:[#allocation6 + $0xc8c] ss:$16 sps:$4 sm:$0xff]   ;;  %v6078_v42 = vld [vmem:[#allocation6 + $0xde8] ss:$16 sps:$4 sm:$0xff]  }
 0x232   :  { %4346 = vmatpush1.bf16.msra.mxu0 %v6129_v21  ;;  %v6083_v21 = vld [vmem:[#allocation6 + $0xe0c] ss:$16 sps:$4 sm:$0xff]  }
 0x233   :  { %4347 = vmatprep.subr.bf16.mxu0 %v6134_v25  ;;  %v6084_v25 = vld [vmem:[#allocation6 + $0xe28] ss:$16 sps:$4 sm:$0xff]  }
 0x234   :  { %3854 = vmatpush1.bf16.msra.mxu1 %v6036_v23  ;;  %v6086_v23 = vld [vmem:[#allocation6 + $0xe2c] ss:$16 sps:$4 sm:$0xff]  }
 0x235   :  { %3855 = vmatprep.subr.bf16.mxu1 %v6041_v26  ;;  %v6089_v26 = vld [vmem:[#allocation6 + $0xe4c] ss:$16 sps:$4 sm:$0xff]  }
 0x236   :  { %4348 = vmatpush1.bf16.msra.mxu0 %v6132_v47  ;;  %v6087_v47 = vld [vmem:[#allocation6 + $0xe48] ss:$16 sps:$4 sm:$0xff]  }
 0x237   :  { %4349 = vmatprep.subr.bf16.mxu0 %v6137_v27  ;;  %v6092_v27 = vld [vmem:[#allocation6 + $0xe6c] ss:$16 sps:$4 sm:$0xff]  }
 0x238   :  { %3856 = vmatpush1.bf16.msra.mxu1 %v6039_v28  ;;  %v6090_v28 = vld [vmem:[#allocation6 + $0xe68] ss:$16 sps:$4 sm:$0xff]  }
 0x239   :  { %3857 = vmatprep.subr.bf16.mxu1 %v6044_v29  ;;  %v6095_v29 = vld [vmem:[#allocation6 + $0xe8c] ss:$16 sps:$4 sm:$0xff]  }
 0x23a   :  { %4350 = vmatpush1.bf16.msra.mxu0 %v6135_v24  ;;  %v6093_v24 = vld [vmem:[#allocation6 + $0xe88] ss:$16 sps:$4 sm:$0xff]  }
 0x23b   :  { %4351 = vmatprep.subr.bf16.mxu0 %v6140_v30  ;;  %v6098_v30 = vld [vmem:[#allocation6 + $0xeac] ss:$16 sps:$4 sm:$0xff]  }
 0x23c   :  { %3858 = vmatpush1.bf16.msra.mxu1 %v6042_v31  ;;  %v6101_v31 = vld [vmem:[#allocation6 + $0xecc] ss:$16 sps:$4 sm:$0xff]  }
 0x23d   :  { %3859 = vmatprep.subr.bf16.mxu1 %v6047_v61  ;;  %v6173_v61 = vld [vmem:[#allocation9 + $0xe4] ss:$8 sps:$4 sm:$0xff]  }
 0x23e   :  { %4352 = vmatpush1.bf16.msra.mxu0 %v6138_v32  ;;  %v6171_v32 = vld [vmem:[#allocation9 + $0xe0] ss:$8 sps:$4 sm:$0xff]  }
 0x23f   :  { %4353 = vmatprep.subr.bf16.mxu0 %v6143_v35  ;;  %v6104_v35 = vld [vmem:[#allocation6 + $0xeec] ss:$16 sps:$4 sm:$0xff]  }
 0x240   :  { %3860 = vmatpush1.bf16.msra.mxu1 %v6045_v12  ;;  %v6176_v12 = vld [vmem:[#allocation9 + $0xf4] ss:$8 sps:$4 sm:$0xff]  }
 0x241   :  { %3861 = vmatprep.subr.bf16.mxu1 %v6050_v36  ;;  %v6102_v36 = vld [vmem:[#allocation6 + $0xee8] ss:$16 sps:$4 sm:$0xff]  }
 0x242   :  { %4354 = vmatpush1.bf16.msra.mxu0 %v6141_v37  ;;  %v6174_v37 = vld [vmem:[#allocation9 + $0xf0] ss:$8 sps:$4 sm:$0xff]  }
 0x243   :  { %4355 = vmatprep.subr.bf16.mxu0 %v6146_v39  ;;  %v6107_v39 = vld [vmem:[#allocation6 + $0xf0c] ss:$16 sps:$4 sm:$0xff]  }
 0x244   :  { %3862 = vmatpush1.bf16.msra.mxu1 %v6048_v40  ;;  %v6105_v40 = vld [vmem:[#allocation6 + $0xf08] ss:$16 sps:$4 sm:$0xff]  }
 0x245   :  { %3863 = vmatprep.subr.bf16.mxu1 %v6053_v41  ;;  %v6110_v41 = vld [vmem:[#allocation6 + $0xf2c] ss:$16 sps:$4 sm:$0xff]  }
 0x246   :  { %4356 = vmatpush1.bf16.msra.mxu0 %v6144_v55  ;;  %v6179_v55 = vld [vmem:[#allocation9 + $0x104] ss:$8 sps:$4 sm:$0xff]  }
 0x247   :  { %4357 = vmatprep.subr.bf16.mxu0 %v6149_v43  ;;  %v6108_v43 = vld [vmem:[#allocation6 + $0xf28] ss:$16 sps:$4 sm:$0xff]  }
 0x248   :  { %3864 = vmatpush1.bf16.msra.mxu1 %v6051_v45  ;;  %v6113_v45 = vld [vmem:[#allocation6 + $0xf4c] ss:$16 sps:$4 sm:$0xff]  }
 0x249   :  { %3865 = vmatprep.subr.bf16.mxu1 %v6056_v15  ;;  %v6111_v15 = vld [vmem:[#allocation6 + $0xf48] ss:$16 sps:$4 sm:$0xff]  }
 0x24a   :  { %4358 = vmatpush1.bf16.msra.mxu0 %v6147_v46  ;;  %v6116_v46 = vld [vmem:[#allocation6 + $0xf6c] ss:$16 sps:$4 sm:$0xff]  }
 0x24b   :  { %4359 = vmatprep.subr.bf16.mxu0 %v6152_v48  ;;  %v6114_v48 = vld [vmem:[#allocation6 + $0xf68] ss:$16 sps:$4 sm:$0xff]  }
 0x24c   :  { %3866 = vmatpush1.bf16.msra.mxu1 %v6054_v49  ;;  %v6119_v49 = vld [vmem:[#allocation6 + $0xf8c] ss:$16 sps:$4 sm:$0xff]  }
 0x24d   :  { %3867 = vmatprep.subr.bf16.mxu1 %v6059_v50  ;;  %v6117_v50 = vld [vmem:[#allocation6 + $0xf88] ss:$16 sps:$4 sm:$0xff]  }
 0x24e   :  { %4360 = vmatpush1.bf16.msra.mxu0 %v6150_v44  ;;  %v6122_v44 = vld [vmem:[#allocation6 + $0xfac] ss:$16 sps:$4 sm:$0xff]  }
 0x24f   :  { %4361 = vmatprep.subr.bf16.mxu0 %v6155_v51  ;;  %v6120_v51 = vld [vmem:[#allocation6 + $0xfa8] ss:$16 sps:$4 sm:$0xff]  }
 0x250   :  { %3868 = vmatpush1.bf16.msra.mxu1 %v6057_v52  ;;  %v6125_v52 = vld [vmem:[#allocation6 + $0xfcc] ss:$16 sps:$4 sm:$0xff]  }
 0x251   :  { %3869 = vmatprep.subr.bf16.mxu1 %v6062_v53  ;;  %v6123_v53 = vld [vmem:[#allocation6 + $0xfc8] ss:$16 sps:$4 sm:$0xff]  }
 0x252   :  { %4362 = vmatpush1.bf16.msra.mxu0 %v6153_v54  ;;  %v6128_v54 = vld [vmem:[#allocation6 + $0xfec] ss:$16 sps:$4 sm:$0xff]  }
 0x253   :  { %4363 = vmatprep.subr.bf16.mxu0 %v6158_v56  ;;  %v6126_v56 = vld [vmem:[#allocation6 + $0xfe8] ss:$16 sps:$4 sm:$0xff]  }
 0x254   :  { %3870 = vmatpush1.bf16.msra.mxu1 %v6060_v57  ;;  %v669_v57 = vlaneseq }
 0x255   :  { %3871 = vmatprep.subr.bf16.mxu1 %v6065_v58 }
 0x256   :  { %4364 = vmatpush1.bf16.msra.mxu0 %v6156_v59  ;;  %v6614_v58 = vshrl.u32 %v669_v57, 7  ;;  %v6219_v57 = vld [vmem:[#allocation9 + $0x1e0] ss:$8 sps:$4 sm:$0xff]  }
 0x257   :  { %4365 = vmatprep.subr.bf16.mxu0 %v6161_v33  ;;  %v6617_v33 = vld [vmem:[#allocation8] sm:$0xf] }
 0x258   :  { %3872 = vmatpush1.bf16.msra.mxu1 %v6063_v60  ;;  %v671_v59 = vsub.s32 0, %v6614_v58  ;;  %v675_v60 = vsub.s32 1, %v6614_v58 }
 0x259   :  { %3873 = vmatprep.subr.bf16.mxu1 %v6068_v62 }
 0x25a   :  { %4366 = vmatpush1.bf16.msra.mxu0 %v6159_v63  ;;  %v672_v62 = vrot.slane %v6617_v33, %v671_v59  ;;  %v676_v63 = vrot.slane %v6617_v33, %v675_v60 }
 0x25b   :  { %4367 = vmatprep.subr.bf16.mxu0 %v6164_v0 }
 0x25c   :  { %3874 = vmatpush1.bf16.msra.mxu1 %v6066_v1  ;;  %v3284_v0 = vadd.f32 %v6582_v2, %v672_v62 }
 0x25d   :  { %3875 = vmatprep.subr.bf16.mxu1 %v6071_v6  ;;  %v3288_v6 = vadd.f32 %v6586_v5, %v672_v62  ;;  %v6225_v5 = vld [vmem:[#allocation12 + $0x40] sm:$0xff]   ;;  %v6224_v62 = vld [vmem:[#allocation9 + $0x1f4] ss:$8 sps:$4 sm:$0xff]  }
 0x25e   :  { %4368 = vmatpush1.bf16.msra.mxu0 %v6162_v8 }
 0x25f   :  { %4369 = vmatprep.subr.bf16.mxu0 %v6167_v34 }
 0x260   :  { %3876 = vmatpush1.bf16.msra.mxu1 %v6069_v9  ;;  %v3290_v9 = vadd.f32 %v6588_v7, %v676_v63  ;;  %v6180_v7 = vld [vmem:[#allocation9 + $0x110] ss:$8 sps:$4 sm:$0xff]  }
 0x261   :  { %3877 = vmatprep.subr.bf16.mxu1 %v6074_v10 }
 0x262   :  { %4370 = vmatpush1.bf16.msra.mxu0 %v6165_v11 }
 0x263   :  { %4371 = vmatprep.subr.bf16.mxu0 %v6170_v14 }
 0x264   :  { %3878 = vmatpush1.bf16.msra.mxu1 %v6072_v38 }
 0x265   :  { %3879 = vmatprep.subr.bf16.mxu1 %v6077_v16 }
 0x266   :  { %4372 = vmatpush1.bf16.msra.mxu0 %v6168_v17 }
 0x267   :  { %4373 = vmatprep.subr.bf16.mxu0 %v6173_v61  ;;  %v6232_v61 = vld [vmem:[#allocation12 + $0x18] sm:$0xff]  }
 0x268   :  { %3880 = vmatpush1.bf16.msra.mxu1 %v6075_v18 }
 0x269   :  { %3881 = vmatprep.subr.bf16.mxu1 %v6080_v20 }
 0x26a   :  { %4374 = vmatpush1.bf16.msra.mxu0 %v6171_v32  ;;  %v6189_v32 = vld [vmem:[#allocation9 + $0x140] ss:$8 sps:$4 sm:$0xff]  }
 0x26b   :  { %4375 = vmatprep.subr.bf16.mxu0 %v6176_v12  ;;  %v6234_v12 = vld [vmem:[#allocation12 + $0x20] sm:$0xff]  }
 0x26c   :  { %3882 = vmatpush1.bf16.msra.mxu1 %v6078_v42 }
 0x26d   :  { %3894 = vmatprep.subr.bf16.mxu1 %v6083_v21 }
 0x26e   :  { %4376 = vmatpush1.bf16.msra.mxu0 %v6174_v37  ;;  %v6192_v37 = vld [vmem:[#allocation9 + $0x150] ss:$8 sps:$4 sm:$0xff]  }
 0x26f   :  { %3884 = vmatmul.mubr.bf16.vlgmr.msra.gmra.mrb[4].mxu1 %v6598_v4  ;;  %v6096_v4 = vld [vmem:[#allocation6 + $0xea8] ss:$16 sps:$4 sm:$0xff]   ;;  %4388 = vmatprep.subr.bf16.mxu0 %v6179_v55  ;;  %v6198_v55 = vld [vmem:[#allocation9 + $0x170] ss:$8 sps:$4 sm:$0xff]  }
 0x270   :  { %3895 = vmatpush1.bf16.msra.mxu1 %v6081_v22  ;;  %3926 = vmatprep.mubr.bf16.mxu1 %v6600_v13  ;;  %v6099_v13 = vld [vmem:[#allocation6 + $0xec8] ss:$16 sps:$4 sm:$0xff]   ;;  %v6177_v22 = vld [vmem:[#allocation9 + $0x100] ss:$8 sps:$4 sm:$0xff]  }
 0x271   :  { %3896 = vmatprep.subr.bf16.mxu1 %v6086_v23  ;;  %v6226_v23 = vld [vmem:[#allocation12] sm:$0xff]  }
 0x274   :  { %3897 = vmatpush1.bf16.msra.mxu1 %v6084_v25  ;;  %v6227_v25 = vld [vmem:[#allocation12 + $0x48] sm:$0xff]  }
 0x275   :  { %3898 = vmatprep.subr.bf16.mxu1 %v6089_v26  ;;  %v6185_v26 = vld [vmem:[#allocation9 + $0x124] ss:$8 sps:$4 sm:$0xff]  }
 0x278   :  { %3899 = vmatpush1.bf16.msra.mxu1 %v6087_v47  ;;  %v6228_v47 = vld [vmem:[#allocation12 + $0x8] sm:$0xff]  }
 0x279   :  { %3900 = vmatprep.subr.bf16.mxu1 %v6092_v27  ;;  %v6229_v27 = vld [vmem:[#allocation12 + $0x50] sm:$0xff]  }
 0x27c   :  { %3901 = vmatpush1.bf16.msra.mxu1 %v6090_v28  ;;  %v6183_v28 = vld [vmem:[#allocation9 + $0x120] ss:$8 sps:$4 sm:$0xff]  }
 0x27d   :  { %3902 = vmatprep.subr.bf16.mxu1 %v6095_v29  ;;  %v6188_v29 = vld [vmem:[#allocation9 + $0x134] ss:$8 sps:$4 sm:$0xff]  }
 0x280   :  { %3903 = vmatpush1.bf16.msra.mxu1 %v6093_v24  ;;  %v6230_v24 = vld [vmem:[#allocation12 + $0x10] sm:$0xff]  }
 0x281   :  { %3904 = vmatprep.subr.bf16.mxu1 %v6098_v30  ;;  %v6231_v30 = vld [vmem:[#allocation12 + $0x58] sm:$0xff]  }
 0x284   :  { %3905 = vmatpush1.bf16.msra.mxu1 %v6096_v4  ;;  %v6186_v4 = vld [vmem:[#allocation9 + $0x130] ss:$8 sps:$4 sm:$0xff]  }
 0x285   :  { %3906 = vmatprep.subr.bf16.mxu1 %v6101_v31  ;;  %v6191_v31 = vld [vmem:[#allocation9 + $0x144] ss:$8 sps:$4 sm:$0xff]  }
 0x288   :  { %3907 = vmatpush1.bf16.msra.mxu1 %v6099_v13  ;;  %v6233_v13 = vld [vmem:[#allocation12 + $0x60] sm:$0xff]  }
 0x289   :  { %3908 = vmatprep.subr.bf16.mxu1 %v6104_v35  ;;  %v6194_v35 = vld [vmem:[#allocation9 + $0x154] ss:$8 sps:$4 sm:$0xff]  }
 0x28c   :  { %3909 = vmatpush1.bf16.msra.mxu1 %v6102_v36  ;;  %v6235_v36 = vld [vmem:[#allocation12 + $0x68] sm:$0xff]  }
 0x28d   :  { %3910 = vmatprep.subr.bf16.mxu1 %v6107_v39  ;;  %v6197_v39 = vld [vmem:[#allocation9 + $0x164] ss:$8 sps:$4 sm:$0xff]  }
 0x290   :  { %3911 = vmatpush1.bf16.msra.mxu1 %v6105_v40  ;;  %v6195_v40 = vld [vmem:[#allocation9 + $0x160] ss:$8 sps:$4 sm:$0xff]  }
 0x291   :  { %3912 = vmatprep.subr.bf16.mxu1 %v6110_v41  ;;  %v6200_v41 = vld [vmem:[#allocation9 + $0x174] ss:$8 sps:$4 sm:$0xff]  }
 0x294   :  { %3913 = vmatpush1.bf16.msra.mxu1 %v6108_v43  ;;  %v6203_v43 = vld [vmem:[#allocation9 + $0x184] ss:$8 sps:$4 sm:$0xff]  }
 0x295   :  { %3914 = vmatprep.subr.bf16.mxu1 %v6113_v45  ;;  %v6201_v45 = vld [vmem:[#allocation9 + $0x180] ss:$8 sps:$4 sm:$0xff]  }
 0x298   :  { %3915 = vmatpush1.bf16.msra.mxu1 %v6111_v15  ;;  %v6206_v15 = vld [vmem:[#allocation9 + $0x194] ss:$8 sps:$4 sm:$0xff]  }
 0x299   :  { %3916 = vmatprep.subr.bf16.mxu1 %v6116_v46  ;;  %v6204_v46 = vld [vmem:[#allocation9 + $0x190] ss:$8 sps:$4 sm:$0xff]  }
 0x29c   :  { %3917 = vmatpush1.bf16.msra.mxu1 %v6114_v48  ;;  %v6209_v48 = vld [vmem:[#allocation9 + $0x1a4] ss:$8 sps:$4 sm:$0xff]  }
 0x29d   :  { %3918 = vmatprep.subr.bf16.mxu1 %v6119_v49  ;;  %v6207_v49 = vld [vmem:[#allocation9 + $0x1a0] ss:$8 sps:$4 sm:$0xff]  }
 0x2a0   :  { %3919 = vmatpush1.bf16.msra.mxu1 %v6117_v50  ;;  %v6212_v50 = vld [vmem:[#allocation9 + $0x1b4] ss:$8 sps:$4 sm:$0xff]  }
 0x2a1   :  { %3920 = vmatprep.subr.bf16.mxu1 %v6122_v44  ;;  %v6210_v44 = vld [vmem:[#allocation9 + $0x1b0] ss:$8 sps:$4 sm:$0xff]  }
 0x2a4   :  { %3921 = vmatpush1.bf16.msra.mxu1 %v6120_v51  ;;  %v6215_v51 = vld [vmem:[#allocation9 + $0x1c4] ss:$8 sps:$4 sm:$0xff]  }
 0x2a5   :  { %3922 = vmatprep.subr.bf16.mxu1 %v6125_v52  ;;  %v6213_v52 = vld [vmem:[#allocation9 + $0x1c0] ss:$8 sps:$4 sm:$0xff]  }
 0x2a8   :  { %3923 = vmatpush1.bf16.msra.mxu1 %v6123_v53  ;;  %v6218_v53 = vld [vmem:[#allocation9 + $0x1d4] ss:$8 sps:$4 sm:$0xff]  }
 0x2a9   :  { %3924 = vmatprep.subr.bf16.mxu1 %v6128_v54  ;;  %v6216_v54 = vld [vmem:[#allocation9 + $0x1d0] ss:$8 sps:$4 sm:$0xff]  }
 0x2ac   :  { %3925 = vmatpush1.bf16.msra.mxu1 %v6126_v56  ;;  %v6221_v56 = vld [vmem:[#allocation9 + $0x1e4] ss:$8 sps:$4 sm:$0xff]  }
 0x2ad   :  { %5253 = vmatprep.subr.bf16.mxu1 %v6225_v5  ;;  %v6239_v5 = vld [vmem:[#allocation12 + $0x78] sm:$0xff]  }
 0x2af   :  { %3927 = vmatmul.mubr.bf16.vlgmr.msra.gmra.mrb[4].mxu1 %v6606_v19  ;;  %v3286_v19 = vadd.f32 %v6584_v3, %v676_v63  ;;  %v6182_v3 = vld [vmem:[#allocation9 + $0x114] ss:$8 sps:$4 sm:$0xff]   ;;  %v6222_v63 = vld [vmem:[#allocation9 + $0x1f0] ss:$8 sps:$4 sm:$0xff]  }
 0x2b0   :  { %5254 = vmatpush3.bf16.msra.mxu1 %v6226_v23  ;;  %v6240_v23 = vld [vmem:[#allocation12 + $0x38] sm:$0xff]  }
 0x2b1   :  { %5255 = vmatprep.subr.bf16.mxu1 %v6227_v25  ;;  %v4013_v25 = vld [vmem:[#allocation11] sm:$0x3] }
 0x2b4   :  { %5256 = vmatpush3.bf16.msra.mxu1 %v6228_v47 }
 0x2b5   :  { %5257 = vmatprep.subr.bf16.mxu1 %v6229_v27 }
 0x2b8   :  { %5258 = vmatpush3.bf16.msra.mxu1 %v6230_v24 }
 0x2b9   :  { %5259 = vmatprep.subr.bf16.mxu1 %v6231_v30 }
 0x2bc   :  { %5260 = vmatpush3.bf16.msra.mxu1 %v6232_v61 }
 0x2bd   :  { %5261 = vmatprep.subr.bf16.mxu1 %v6233_v13 }
 0x2c0   :  { %5262 = vmatpush3.bf16.msra.mxu1 %v6234_v12 }
 0x2c1   :  { %5263 = vmatprep.subr.bf16.mxu1 %v6235_v36 }
 0x303   :  { %v3584_v1 = vpop.f32.mrb[0].mxu0 }
 0x304   :  { %v5276_v8 = vadd.f32 %v3584_v1, %v3284_v0  ;;  %v3586_v34 = vpop.f32.mrb[1].mxu0  ;;  %v679_v0 = vsub.s32 2, %v6614_v58 }
 0x305   :  { %v5278_v10 = vadd.f32 %v3586_v34, %v3286_v19  ;;  %v3588_v11 = vpop.f32.mrb[2].mxu0  ;;  %v683_v19 = vsub.s32 3, %v6614_v58  ;;  %v4470_v58 = vstv %s6662_s6  ;;  %s6381_s6 = scalar_lea.vmem %s4636_s18, 128 }
 0x306   :  { %v5280_v14 = vadd.f32 %v3588_v11, %v3288_v6  ;;  %v3590_v38 = vpop.f32.mrb[3].mxu0  ;;  %v3937_v17 = vmax.f32 %v5276_v8, 0.0  ;;  %v680_v1 = vrot.slane %v6617_v33, %v679_v0  ;;  %p6382_p6 = scmp.ne.s32.totalorder %s4636_s18, %s6381_s6  ;;  %p6387_p8 = scmp.lt.s32.totalorder %s6381_s6, %s6381_s6 }
 0x307   :  { %v5282_v16 = vadd.f32 %v3590_v38, %v3290_v9  ;;  %v3938_v20 = vmax.f32 %v5278_v10, 0.0  ;;  %v684_v6 = vrot.slane %v6617_v33, %v683_v19  ;;  %v6238_v33 = vld [vmem:[#allocation12 + $0x30] sm:$0xff]  }
 0x308   :  { %v3941_v18 = vmax.f32 %v5280_v14, 0.0  ;;  %p6388_p9 = por %p6387_p8, %p6386_p7 }
 0x309   :  { %v3942_v42 = vmax.f32 %v5282_v16, 0.0 }
 0x30a   :  { %v3945_v21 = vpack.c.bf16 %v3941_v18, %v3937_v17  ;;  %p6389_p10 = pnand %p6388_p9, %p6382_p6 }
 0x30b   :  { %v3946_v2 = vpack.c.bf16 %v3942_v42, %v3938_v20 }
 0x30d   :  { %4377 = vmatprep.mubr.bf16.mxu0 %v3946_v2 }
 0x30e   :  { %4378 = vmatmul.mubr.bf16.vlgmr.msra.gmra.mrb[4].mxu0 %v3945_v21 }
 0x30f   :  { %4389 = vmatpush1.bf16.msra.mxu0 %v6177_v22  ;;  %v6236_v22 = vld [vmem:[#allocation12 + $0x28] sm:$0xff]  }
 0x310   :  { %4390 = vmatprep.subr.bf16.mxu0 %v6182_v3  ;;  %5264 = vmatpush3.bf16.msra.mxu1 %v6236_v22  ;;  %v6237_v3 = vld [vmem:[#allocation12 + $0x70] sm:$0xff]  }
 0x311   :  { %5265 = vmatprep.subr.bf16.mxu1 %v6237_v3 }
 0x313   :  { %4391 = vmatpush1.bf16.msra.mxu0 %v6180_v7  ;;  %v4018_v7 = vrot.slane %v4013_v25, %v671_v59 }
 0x314   :  { %4392 = vmatprep.subr.bf16.mxu0 %v6185_v26  ;;  %5266 = vmatpush3.bf16.msra.mxu1 %v6238_v33  ;;  %v4022_v26 = vrot.slane %v4013_v25, %v675_v60 }
 0x315   :  { %5267 = vmatprep.subr.bf16.mxu1 %v6239_v5 }
 0x317   :  { %4393 = vmatpush1.bf16.msra.mxu0 %v6183_v28 }
 0x318   :  { %4394 = vmatprep.subr.bf16.mxu0 %v6188_v29  ;;  %5268 = vmatpush3.bf16.msra.mxu1 %v6240_v23 }
 0x31b   :  { %4395 = vmatpush1.bf16.msra.mxu0 %v6186_v4 }
 0x31c   :  { %4396 = vmatprep.subr.bf16.mxu0 %v6191_v31 }
 0x31f   :  { %4397 = vmatpush1.bf16.msra.mxu0 %v6189_v32 }
 0x320   :  { %4398 = vmatprep.subr.bf16.mxu0 %v6194_v35 }
 0x323   :  { %4399 = vmatpush1.bf16.msra.mxu0 %v6192_v37 }
 0x324   :  { %4400 = vmatprep.subr.bf16.mxu0 %v6197_v39 }
 0x327   :  { %4401 = vmatpush1.bf16.msra.mxu0 %v6195_v40 }
 0x328   :  { %4402 = vmatprep.subr.bf16.mxu0 %v6200_v41 }
 0x32b   :  { %4403 = vmatpush1.bf16.msra.mxu0 %v6198_v55 }
 0x32c   :  { %4404 = vmatprep.subr.bf16.mxu0 %v6203_v43 }
 0x32f   :  { %4405 = vmatpush1.bf16.msra.mxu0 %v6201_v45 }
 0x330   :  { %4406 = vmatprep.subr.bf16.mxu0 %v6206_v15 }
 0x333   :  { %4407 = vmatpush1.bf16.msra.mxu0 %v6204_v46 }
 0x334   :  { %4408 = vmatprep.subr.bf16.mxu0 %v6209_v48 }
 0x337   :  { %4409 = vmatpush1.bf16.msra.mxu0 %v6207_v49 }
 0x338   :  { %4410 = vmatprep.subr.bf16.mxu0 %v6212_v50 }
 0x33b   :  { %4411 = vmatpush1.bf16.msra.mxu0 %v6210_v44 }
 0x33c   :  { %4412 = vmatprep.subr.bf16.mxu0 %v6215_v51 }
 0x33f   :  { %4413 = vmatpush1.bf16.msra.mxu0 %v6213_v52 }
 0x340   :  { %4414 = vmatprep.subr.bf16.mxu0 %v6218_v53 }
 0x343   :  { %4415 = vmatpush1.bf16.msra.mxu0 %v6216_v54 }
 0x344   :  { %4416 = vmatprep.subr.bf16.mxu0 %v6221_v56 }
 0x347   :  { %4417 = vmatpush1.bf16.msra.mxu0 %v6219_v57 }
 0x348   :  { %4418 = vmatprep.subr.bf16.mxu0 %v6224_v62 }
 0x34b   :  { %4419 = vmatpush1.bf16.msra.mxu0 %v6222_v63 }
 0x382   :  { %v3928_v8 = vpop.f32.mrb[4].mxu1 }
 0x383   :  { %v5283_v34 = vadd.f32 %v3928_v8, %v680_v1  ;;  %v3930_v9 = vpop.f32.mrb[5].mxu1 }
 0x384   :  { %v5284_v10 = vadd.f32 %v3930_v9, %v684_v6  ;;  %v3932_v11 = vpop.f32.mrb[6].mxu1 }
 0x385   :  { %v5285_v14 = vadd.f32 %v3932_v11, %v680_v1  ;;  %v3934_v38 = vpop.f32.mrb[7].mxu1  ;;  %v3939_v17 = vmax.f32 %v5283_v34, 0.0 }
 0x386   :  { %v5286_v16 = vadd.f32 %v3934_v38, %v684_v6  ;;  %v3940_v20 = vmax.f32 %v5284_v10, 0.0 }
 0x387   :  { %v3943_v18 = vmax.f32 %v5285_v14, 0.0 }
 0x388   :  { %v3944_v42 = vmax.f32 %v5286_v16, 0.0 }
 0x389   :  { %v3947_v21 = vpack.c.bf16 %v3943_v18, %v3939_v17 }
 0x38a   :  { %v3948_v2 = vpack.c.bf16 %v3944_v42, %v3940_v20 }
 0x38c   :  { %4420 = vmatprep.mubr.bf16.mxu0 %v3948_v2 }
 0x38d   :  { %4421 = vmatmul.mubr.bf16.vlgmr.msra.gmra.mrb[4].mxu0 %v3947_v21 }
 0x460   :  { %v4422_v47 = vpop.f32.mrb[4].mxu0 }
 0x461   :  { %v5287_v27 = vadd.f32 %v4422_v47, %v4018_v7  ;;  %v4424_v28 = vpop.f32.mrb[5].mxu0 }
 0x462   :  { %v5288_v29 = vadd.f32 %v4424_v28, %v4022_v26  ;;  %v4426_v24 = vpop.f32.mrb[6].mxu0 }
 0x463   :  { %v5289_v30 = vadd.f32 %v4426_v24, %v4018_v7  ;;  %v4428_v4 = vpop.f32.mrb[7].mxu0  ;;  %v4431_v61 = vmax.f32 %v5287_v27, 0.0 }
 0x464   :  { %v5290_v31 = vadd.f32 %v4428_v4, %v4022_v26  ;;  %v4432_v32 = vmax.f32 %v5288_v29, 0.0 }
 0x465   :  { %v4433_v13 = vmax.f32 %v5289_v30, 0.0 }
 0x466   :  { %v4434_v35 = vmax.f32 %v5290_v31, 0.0 }
 0x467   :  { %v4435_v12 = vpack.c.bf16 %v4433_v13, %v4431_v61 }
 0x468   :  { %v4436_v36 = vpack.c.bf16 %v4434_v35, %v4432_v32 }
 0x46a   :  { %4599 = vmatprep.mubr.bf16.mxu1 %v4436_v36 }
 0x46b   :  { %4600 = vmatmul.mubr.bf16.vlgmr.msra.gmra.mrb[8].mxu1 %v4435_v12 }
 0x53e   :  { %v5269_v59 = vpop.f32.mrb[8].mxu1 }
 0x53f   :  { %v5270_v60 = vpop.f32.mrb[9].mxu1 }
 0x540   :  { %v5271_v37 = vadd.f32 %v5270_v60, %v5269_v59  ;;  %v5272_v39 = vpop.f32.mrb[10].mxu1 }
 0x541   :  { %v5273_v40 = vpop.f32.mrb[11].mxu1 }
 0x542   :  { %v4602_v41 = vadd.f32 %v5271_v37, %v4470_v58  ;;  %v5274_v55 = vadd.f32 %v5273_v40, %v5272_v39 }
 0x544   :  { %v5242_v43 = vmul.f32 -1.442695, %v4602_v41  ;;  %v4605_v45 = vadd.f32 %v5274_v55, %v4470_v58 }
 0x546   :  { %6241 = vpow2.f32 %v5242_v43  ;;  %v5243_v15 = vmul.f32 -1.442695, %v4605_v45 }
 0x548   :  { %6243 = vpow2.f32 %v5243_v15 }
 0x550   :  { %v6242_v46 = vpop.eup %6241 }
 0x551   :  { %v4614_v48 = vadd.f32 1.0, %v6242_v46 }
 0x552   :  { %v6244_v49 = vpop.eup %6243 }
 0x553   :  { %v4615_v50 = vadd.f32 1.0, %v6244_v49  ;;  %6245 = vrcp.f32 %v4614_v48 }
 0x555   :  { %6247 = vrcp.f32 %v4615_v50 }
 0x55d   :  { %v6246_v44 = vpop.eup %6245 }
 0x55f   :  { %v6248_v51 = vpop.eup %6247 }
 0x560   :  { %v5251_v52 = vpack.c.bf16 %v6248_v51, %v6246_v44 }
 0x562   :  { %5252 = vst [vmem:[#allocation14] sm:$0xff] %v5251_v52  }
 0x563   :  { %6392 = shalt.err (!%p6389_p10)
}
 0x564   :  { %s6393_s30 = scalar_lea.hbm %s6663_s7, 128 }
 0x565   :  { %p6394_p11 = scmp.ne.s32.totalorder %s6663_s7, %s6393_s30  ;;  %p6397_p12 = scmp.lt.u32.totalorder %s6393_s30, %s6663_s7 }
 0x567   :  { %p6399_p13 = pnand %p6397_p12, %p6394_p11 }
 0x569   :  { %6402 = shalt.err (!%p6399_p13)
}
 0x56a   :  { %4641 = dma.vmem_to_hbm [thread:$0]  %s4636_s18, 128, %s6663_s7, [#allocation5], %s6424_s4, %s6424_s4, %s6425_s21  }
 0x56b   :  { %6411 = dma.done.wait [#allocation5], 128  }
 0x56c   :  { %6412 = vsyncadd [#allocation5], 4294967168 }
 0x56d   :  { %4645 = vsyncpa [#allocation4], 1 }
 0x56e   :  { %4646 = vsyncpa [#allocation7], 1 }
 0x56f   :  { %4647 = vsyncpa [#allocation10], 1 }
 0x570   :  { %4648 = vsyncpa [#allocation13], 1 }
 0x571   :  { %4649 = vsyncpa [#allocation5], 1 }

</bundles_post_ra>
